<compile_context>
chip_gen: v7x
topology: tpu7x:2x2x1
jax: 0.10.0
libtpu: 0.0.40
codegen_flags: <defaults>
</compile_context>

<pallas_src>
import math
import jax
import jax.numpy as jnp
from jax import lax
from jax.experimental import pallas as pl
from jax.experimental.pallas import tpu as pltpu  # noqa: F401

# ------------------------------- config -------------------------------------
IMAGE_SIZE = 16
PATCH_SIZE = 8
CHANNELS = 3
DIM = 32
DEPTH = 2
HEADS = 4
DIM_HEAD = 8
MLP_DIM = 64
NUM_CLASSES = 10

NUM_PATCHES = (IMAGE_SIZE // PATCH_SIZE) ** 2        # 4
PATCH_DIM = CHANNELS * PATCH_SIZE ** 2               # 192
SEQ = NUM_PATCHES + 1                                # 5 (cls token + patches)
INNER = HEADS * DIM_HEAD                             # 32
EPS = 1e-5                                           # nn.LayerNorm default
SCALE = DIM_HEAD ** -0.5
OUT_LANES = 128                                      # lane-dense padded head width

N_LAYER_REFS = 11                                    # refs per transformer layer


# --------------------------- kernel helpers ----------------------------------
def _layernorm(x, w, b):
    mu = jnp.mean(x, axis=-1, keepdims=True)
    var = jnp.mean((x - mu) ** 2, axis=-1, keepdims=True)
    return (x - mu) * lax.rsqrt(var + EPS) * w + b


def _gelu(x):
    # exact (erf-based) GELU, matching torch.nn.GELU default
    return 0.5 * x * (1.0 + lax.erf(x * (1.0 / math.sqrt(2.0))))


# ------------------------------- fused kernel --------------------------------
def _vit_kernel(*refs):
    """Whole ViT forward for the full batch in one kernel invocation.

    refs = (patches_pad, emb_bias, patch_w,
            [ln1w, ln1b, wqkv, wo, bo, ln2w, ln2b, w1, b1, w2, b2] * DEPTH,
            head_lnw, head_lnb, head_w_pad, head_b_pad, out)
    """
    patches_ref, bias_ref, pw_ref = refs[:3]
    o_ref = refs[-1]
    layer_refs = [refs[3 + i * N_LAYER_REFS: 3 + (i + 1) * N_LAYER_REFS]
                  for i in range(DEPTH)]
    hlnw_ref, hlnb_ref, hw_ref, hb_ref = refs[3 + DEPTH * N_LAYER_REFS:-1]

    B = o_ref.shape[0]
    BS = B * SEQ

    # ---- patch embedding ----
    # cls token, positional embedding and the patch-linear bias are all folded
    # into bias_ref by the wrapper (the zero "cls patch" rows contribute 0).
    x = (jnp.dot(patches_ref[...], pw_ref[...],
                 preferred_element_type=jnp.float32) + bias_ref[...])   # (BS, DIM)
    # TODO(synk): nn.Dropout (emb/attn/ff) is identity here (inference / p=0).

    for (ln1w, ln1b, wqkv, wo, bo, ln2w, ln2b, w1, b1, w2, b2) in layer_refs:
        # ---- Residual(PreNorm(Attention)) ----
        y = _layernorm(x, ln1w[...], ln1b[...])                          # (BS, DIM)

        # single fused lane-dense QKV projection: one (BS,32)x(32,96) matmul
        qkv = jnp.dot(y, wqkv[...], preferred_element_type=jnp.float32)  # (BS, 96)
        qkv = qkv.reshape(B, SEQ, 3 * INNER)

        # per-head attention on static lane slices (HEADS=4, fully unrolled);
        # batched over B with proven 3-D einsum patterns -- no broadcast_to,
        # no replicated weights, no 4-D transposes.
        head_outs = []
        for h in range(HEADS):
            lo = h * DIM_HEAD
            qh = qkv[:, :, lo:lo + DIM_HEAD]                             # (B,SEQ,DH)
            kh = qkv[:, :, INNER + lo:INNER + lo + DIM_HEAD]
            vh = qkv[:, :, 2 * INNER + lo:2 * INNER + lo + DIM_HEAD]

            dots = jnp.einsum('bie,bje->bij', qh, kh,
                              preferred_element_type=jnp.float32) * SCALE
            dots = dots - jnp.max(dots, axis=-1, keepdims=True)
            e = jnp.exp(dots)
            attn = e * pl.reciprocal(jnp.sum(e, axis=-1, keepdims=True),
                                     approx=True)
            head_outs.append(jnp.einsum('bij,bje->bie', attn, vh,
                                        preferred_element_type=jnp.float32))

        # 'b h n d -> b n (h d)' = lane concat, then ONE output projection
        out = jnp.concatenate(head_outs, axis=-1).reshape(BS, INNER)     # (BS, 32)
        x = x + jnp.dot(out, wo[...],
                        preferred_element_type=jnp.float32) + bo[...]

        # ---- Residual(PreNorm(FeedForward)) ----
        y = _layernorm(x, ln2w[...], ln2b[...])
        h1 = _gelu(jnp.dot(y, w1[...],
                           preferred_element_type=jnp.float32) + b1[...])
        x = x + jnp.dot(h1, w2[...],
                        preferred_element_type=jnp.float32) + b2[...]

    # ---- pool='cls' + mlp head (LayerNorm + lane-padded Linear) ----
    cls_out = x.reshape(B, SEQ, DIM)[:, 0, :]                            # (B, DIM)
    yh = _layernorm(cls_out, hlnw_ref[...], hlnb_ref[...])
    o_ref[...] = (jnp.dot(yh, hw_ref[...],
                          preferred_element_type=jnp.float32)
                  + hb_ref[...]).astype(o_ref.dtype)


# ------------------------------ parameters -----------------------------------
def init_params(key):
    keys = iter(jax.random.split(key, 8 + DEPTH * 8))

    def nrm(shape, std=0.02):
        return jax.random.normal(next(keys), shape, jnp.float32) * std

    params = {
        'patch_w': nrm((PATCH_DIM, DIM)),
        'patch_b': jnp.zeros((DIM,), jnp.float32),
        'pos': nrm((1, SEQ, DIM), std=1.0),     # torch.randn
        'cls': nrm((1, 1, DIM), std=1.0),       # torch.randn
        'head_lnw': jnp.ones((DIM,), jnp.float32),
        'head_lnb': jnp.zeros((DIM,), jnp.float32),
        'head_w': nrm((DIM, NUM_CLASSES)),
        'head_b': jnp.zeros((NUM_CLASSES,), jnp.float32),
        'layers': [],
    }
    for _ in range(DEPTH):
        lp = [
            jnp.ones((1, DIM), jnp.float32),    # ln1 weight
            jnp.zeros((1, DIM), jnp.float32),   # ln1 bias
            nrm((DIM, 3 * INNER)),              # to_qkv (no bias), kept fused
            nrm((INNER, DIM)),                  # to_out weight (concat-heads)
            jnp.zeros((1, DIM), jnp.float32),   # to_out bias
            jnp.ones((1, DIM), jnp.float32),    # ln2 weight
            jnp.zeros((1, DIM), jnp.float32),   # ln2 bias
            nrm((DIM, MLP_DIM)),                # ff w1
            jnp.zeros((1, MLP_DIM), jnp.float32),
            nrm((MLP_DIM, DIM)),                # ff w2
            jnp.zeros((1, DIM), jnp.float32),
        ]
        params['layers'].append(lp)
    return params


# ------------------------------- forward -------------------------------------
def vit_forward(img, params):
    # img: (B, C, H, W)  -- NCHW like PyTorch
    B = img.shape[0]
    h = w = IMAGE_SIZE // PATCH_SIZE

    # 'b c (h p1) (w p2) -> b (h w) (p1 p2 c)'  (pure layout glue)
    x = img.reshape(B, CHANNELS, h, PATCH_SIZE, w, PATCH_SIZE)
    x = x.transpose(0, 2, 4, 3, 5, 1)                     # b h w p1 p2 c
    patches = x.reshape(B, NUM_PATCHES, PATCH_DIM)

    # zero "cls patch" row per image -> kernel never concats along tokens
    patches_pad = jnp.concatenate(
        [jnp.zeros((B, 1, PATCH_DIM), patches.dtype), patches], axis=1
    ).reshape(B * SEQ, PATCH_DIM)

    # pre-combine cls token, positional embedding and patch-linear bias into
    # one additive (B*SEQ, DIM) bias: row 0 of each image = cls + pos[0],
    # rows 1.. = patch_b + pos[i].
    bias = jnp.concatenate(
        [params['cls'][0],                                              # (1, DIM)
         jnp.broadcast_to(params['patch_b'][None, :], (NUM_PATCHES, DIM))],
        axis=0) + params['pos'][0]                                      # (SEQ, DIM)
    emb_bias = jnp.tile(bias, (B, 1))                                   # (B*SEQ, DIM)

    # lane-dense mlp head: zero-pad to 128 output lanes, slice after the call
    head_w = jnp.zeros((DIM, OUT_LANES), jnp.float32)
    head_w = head_w.at[:, :NUM_CLASSES].set(params['head_w'])
    head_b = jnp.zeros((1, OUT_LANES), jnp.float32)
    head_b = head_b.at[0, :NUM_CLASSES].set(params['head_b'])

    args = [patches_pad, emb_bias, params['patch_w']]
    for lp in params['layers']:
        args.extend(lp)
    args.extend([params['head_lnw'].reshape(1, -1),
                 params['head_lnb'].reshape(1, -1),
                 head_w, head_b])

    # Single gridless pallas_call: every array is mapped whole into VMEM
    # (total weights + activations << 1 MiB), one launch, no intermediate
    # HBM traffic.
    logits_pad = pl.pallas_call(
        _vit_kernel,
        out_shape=jax.ShapeDtypeStruct((B, OUT_LANES), jnp.float32),
    )(*args)
    return logits_pad[:, :NUM_CLASSES]


# --------------------------------- main --------------------------------------
if __name__ == "__main__":
    key = jax.random.PRNGKey(0)
    k_img, k_par = jax.random.split(key)
    img = jax.random.normal(k_img, (2, CHANNELS, IMAGE_SIZE, IMAGE_SIZE),
                            jnp.float32)
    params = init_params(k_par)

    logits = jax.jit(vit_forward)(img, params)
    logits = jax.block_until_ready(logits)
    assert logits.shape == (2, NUM_CLASSES)
    assert bool(jnp.all(jnp.isfinite(logits)))
    print("KERNEL_OK")
</pallas_src>

<mosaic_0001>
module attributes {stable_mosaic.version = 11 : i64} {
  func.func @_vit_kernel(%arg0: memref<10x192xf32, #tpu.memory_space<vmem>>, %arg1: memref<10x32xf32, #tpu.memory_space<vmem>>, %arg2: memref<192x32xf32, #tpu.memory_space<vmem>>, %arg3: memref<1x32xf32, #tpu.memory_space<vmem>>, %arg4: memref<1x32xf32, #tpu.memory_space<vmem>>, %arg5: memref<32x96xf32, #tpu.memory_space<vmem>>, %arg6: memref<32x32xf32, #tpu.memory_space<vmem>>, %arg7: memref<1x32xf32, #tpu.memory_space<vmem>>, %arg8: memref<1x32xf32, #tpu.memory_space<vmem>>, %arg9: memref<1x32xf32, #tpu.memory_space<vmem>>, %arg10: memref<32x64xf32, #tpu.memory_space<vmem>>, %arg11: memref<1x64xf32, #tpu.memory_space<vmem>>, %arg12: memref<64x32xf32, #tpu.memory_space<vmem>>, %arg13: memref<1x32xf32, #tpu.memory_space<vmem>>, %arg14: memref<1x32xf32, #tpu.memory_space<vmem>>, %arg15: memref<1x32xf32, #tpu.memory_space<vmem>>, %arg16: memref<32x96xf32, #tpu.memory_space<vmem>>, %arg17: memref<32x32xf32, #tpu.memory_space<vmem>>, %arg18: memref<1x32xf32, #tpu.memory_space<vmem>>, %arg19: memref<1x32xf32, #tpu.memory_space<vmem>>, %arg20: memref<1x32xf32, #tpu.memory_space<vmem>>, %arg21: memref<32x64xf32, #tpu.memory_space<vmem>>, %arg22: memref<1x64xf32, #tpu.memory_space<vmem>>, %arg23: memref<64x32xf32, #tpu.memory_space<vmem>>, %arg24: memref<1x32xf32, #tpu.memory_space<vmem>>, %arg25: memref<1x32xf32, #tpu.memory_space<vmem>>, %arg26: memref<1x32xf32, #tpu.memory_space<vmem>>, %arg27: memref<32x128xf32, #tpu.memory_space<vmem>>, %arg28: memref<1x128xf32, #tpu.memory_space<vmem>>, %arg29: memref<2x128xf32, #tpu.memory_space<vmem>>) attributes {dimension_semantics = [], scalar_prefetch = 0 : i64, scratch_operands = 0 : i64, tpu.core_type = #tpu.core_type<tc>} {
    %c0 = arith.constant 0 : index
    %c0_0 = arith.constant 0 : index
    %0 = vector.load %arg0[%c0, %c0_0] : memref<10x192xf32, #tpu.memory_space<vmem>>, vector<10x192xf32>
    %c0_1 = arith.constant 0 : index
    %c0_2 = arith.constant 0 : index
    %1 = vector.load %arg2[%c0_1, %c0_2] : memref<192x32xf32, #tpu.memory_space<vmem>>, vector<192x32xf32>
    %cst = arith.constant dense<0.000000e+00> : vector<10x32xf32>
    %2 = tpu.matmul %0, %1, %cst {dimension_numbers = #tpu.dot_dimension_numbers<[1], [0], [0], [1], [0, 0, 1, 1], [], []>} : vector<10x192xf32>, vector<192x32xf32>, vector<10x32xf32> -> vector<10x32xf32>
    %c0_3 = arith.constant 0 : index
    %c0_4 = arith.constant 0 : index
    %3 = vector.load %arg1[%c0_3, %c0_4] : memref<10x32xf32, #tpu.memory_space<vmem>>, vector<10x32xf32>
    %4 = arith.addf %2, %3 : vector<10x32xf32>
    %c0_5 = arith.constant 0 : index
    %c0_6 = arith.constant 0 : index
    %5 = vector.load %arg3[%c0_5, %c0_6] : memref<1x32xf32, #tpu.memory_space<vmem>>, vector<1x32xf32>
    %c0_7 = arith.constant 0 : index
    %c0_8 = arith.constant 0 : index
    %6 = vector.load %arg4[%c0_7, %c0_8] : memref<1x32xf32, #tpu.memory_space<vmem>>, vector<1x32xf32>
    %cst_9 = arith.constant dense<0.000000e+00> : vector<10xf32>
    %7 = vector.multi_reduction <add>, %4, %cst_9 [1] : vector<10x32xf32> to vector<10xf32>
    %8 = vector.shape_cast %7 : vector<10xf32> to vector<10x1xf32>
    %cst_10 = arith.constant 3.200000e+01 : f32
    %9 = vector.broadcast %cst_10 : f32 to vector<10x1xf32>
    %10 = arith.divf %8, %9 : vector<10x1xf32>
    %11 = vector.broadcast %10 : vector<10x1xf32> to vector<10x32xf32>
    %12 = arith.subf %4, %11 : vector<10x32xf32>
    %13 = arith.mulf %12, %12 : vector<10x32xf32>
    %cst_11 = arith.constant dense<0.000000e+00> : vector<10xf32>
    %14 = vector.multi_reduction <add>, %13, %cst_11 [1] : vector<10x32xf32> to vector<10xf32>
    %15 = vector.shape_cast %14 : vector<10xf32> to vector<10x1xf32>
    %cst_12 = arith.constant 3.200000e+01 : f32
    %16 = vector.broadcast %cst_12 : f32 to vector<10x1xf32>
    %17 = arith.divf %15, %16 : vector<10x1xf32>
    %18 = vector.broadcast %10 : vector<10x1xf32> to vector<10x32xf32>
    %19 = arith.subf %4, %18 : vector<10x32xf32>
    %cst_13 = arith.constant 9.99999974E-6 : f32
    %20 = vector.broadcast %cst_13 : f32 to vector<10x1xf32>
    %21 = arith.addf %17, %20 : vector<10x1xf32>
    %22 = math.rsqrt %21 : vector<10x1xf32>
    %23 = vector.broadcast %22 : vector<10x1xf32> to vector<10x32xf32>
    %24 = arith.mulf %19, %23 : vector<10x32xf32>
    %25 = vector.broadcast %5 : vector<1x32xf32> to vector<10x32xf32>
    %26 = arith.mulf %24, %25 : vector<10x32xf32>
    %27 = vector.broadcast %6 : vector<1x32xf32> to vector<10x32xf32>
    %28 = arith.addf %26, %27 : vector<10x32xf32>
    %c0_14 = arith.constant 0 : index
    %c0_15 = arith.constant 0 : index
    %29 = vector.load %arg5[%c0_14, %c0_15] : memref<32x96xf32, #tpu.memory_space<vmem>>, vector<32x96xf32>
    %cst_16 = arith.constant dense<0.000000e+00> : vector<10x96xf32>
    %30 = tpu.matmul %28, %29, %cst_16 {dimension_numbers = #tpu.dot_dimension_numbers<[1], [0], [0], [1], [0, 0, 1, 1], [], []>} : vector<10x32xf32>, vector<32x96xf32>, vector<10x96xf32> -> vector<10x96xf32>
    %31 = vector.shape_cast %30 : vector<10x96xf32> to vector<2x5x96xf32>
    %32 = vector.extract_strided_slice %31 {offsets = [0, 0, 0], sizes = [2, 5, 8], strides = [1, 1, 1]} : vector<2x5x96xf32> to vector<2x5x8xf32>
    %33 = vector.extract_strided_slice %31 {offsets = [0, 0, 32], sizes = [2, 5, 8], strides = [1, 1, 1]} : vector<2x5x96xf32> to vector<2x5x8xf32>
    %34 = vector.extract_strided_slice %31 {offsets = [0, 0, 64], sizes = [2, 5, 8], strides = [1, 1, 1]} : vector<2x5x96xf32> to vector<2x5x8xf32>
    "tpu.trace_start"() <{level = 10 : i32, message = "bie,bje->bij"}> : () -> ()
    %cst_17 = arith.constant dense<0.000000e+00> : vector<2x5x5xf32>
    %35 = tpu.matmul %32, %33, %cst_17 {dimension_numbers = #tpu.dot_dimension_numbers<[2], [2], [1], [1], [0, 0, 0, 1, 1, 1], [0], [0]>} : vector<2x5x8xf32>, vector<2x5x8xf32>, vector<2x5x5xf32> -> vector<2x5x5xf32>
    "tpu.trace_stop"() : () -> ()
    %cst_18 = arith.constant 0.353553385 : f32
    %36 = vector.broadcast %cst_18 : f32 to vector<2x5x5xf32>
    %37 = arith.mulf %35, %36 : vector<2x5x5xf32>
    %cst_19 = arith.constant dense<0xFF800000> : vector<2x5xf32>
    %38 = vector.multi_reduction <maximumf>, %37, %cst_19 [2] : vector<2x5x5xf32> to vector<2x5xf32>
    %39 = vector.shape_cast %38 : vector<2x5xf32> to vector<2x5x1xf32>
    %40 = vector.broadcast %39 : vector<2x5x1xf32> to vector<2x5x5xf32>
    %41 = arith.subf %37, %40 : vector<2x5x5xf32>
    %42 = math.exp %41 : vector<2x5x5xf32>
    %cst_20 = arith.constant dense<0.000000e+00> : vector<2x5xf32>
    %43 = vector.multi_reduction <add>, %42, %cst_20 [2] : vector<2x5x5xf32> to vector<2x5xf32>
    %44 = vector.shape_cast %43 : vector<2x5xf32> to vector<2x5x1xf32>
    %45 = tpu.reciprocal %44 {approx = true} : vector<2x5x1xf32> -> vector<2x5x1xf32>
    %46 = vector.broadcast %45 : vector<2x5x1xf32> to vector<2x5x5xf32>
    %47 = arith.mulf %42, %46 : vector<2x5x5xf32>
    "tpu.trace_start"() <{level = 10 : i32, message = "bij,bje->bie"}> : () -> ()
    %cst_21 = arith.constant dense<0.000000e+00> : vector<2x5x8xf32>
    %48 = tpu.matmul %47, %34, %cst_21 {dimension_numbers = #tpu.dot_dimension_numbers<[2], [1], [1], [2], [0, 0, 0, 1, 1, 2], [0], [0]>} : vector<2x5x5xf32>, vector<2x5x8xf32>, vector<2x5x8xf32> -> vector<2x5x8xf32>
    "tpu.trace_stop"() : () -> ()
    %49 = vector.extract_strided_slice %31 {offsets = [0, 0, 8], sizes = [2, 5, 8], strides = [1, 1, 1]} : vector<2x5x96xf32> to vector<2x5x8xf32>
    %50 = vector.extract_strided_slice %31 {offsets = [0, 0, 40], sizes = [2, 5, 8], strides = [1, 1, 1]} : vector<2x5x96xf32> to vector<2x5x8xf32>
    %51 = vector.extract_strided_slice %31 {offsets = [0, 0, 72], sizes = [2, 5, 8], strides = [1, 1, 1]} : vector<2x5x96xf32> to vector<2x5x8xf32>
    "tpu.trace_start"() <{level = 10 : i32, message = "bie,bje->bij"}> : () -> ()
    %cst_22 = arith.constant dense<0.000000e+00> : vector<2x5x5xf32>
    %52 = tpu.matmul %49, %50, %cst_22 {dimension_numbers = #tpu.dot_dimension_numbers<[2], [2], [1], [1], [0, 0, 0, 1, 1, 1], [0], [0]>} : vector<2x5x8xf32>, vector<2x5x8xf32>, vector<2x5x5xf32> -> vector<2x5x5xf32>
    "tpu.trace_stop"() : () -> ()
    %cst_23 = arith.constant 0.353553385 : f32
    %53 = vector.broadcast %cst_23 : f32 to vector<2x5x5xf32>
    %54 = arith.mulf %52, %53 : vector<2x5x5xf32>
    %cst_24 = arith.constant dense<0xFF800000> : vector<2x5xf32>
    %55 = vector.multi_reduction <maximumf>, %54, %cst_24 [2] : vector<2x5x5xf32> to vector<2x5xf32>
    %56 = vector.shape_cast %55 : vector<2x5xf32> to vector<2x5x1xf32>
    %57 = vector.broadcast %56 : vector<2x5x1xf32> to vector<2x5x5xf32>
    %58 = arith.subf %54, %57 : vector<2x5x5xf32>
    %59 = math.exp %58 : vector<2x5x5xf32>
    %cst_25 = arith.constant dense<0.000000e+00> : vector<2x5xf32>
    %60 = vector.multi_reduction <add>, %59, %cst_25 [2] : vector<2x5x5xf32> to vector<2x5xf32>
    %61 = vector.shape_cast %60 : vector<2x5xf32> to vector<2x5x1xf32>
    %62 = tpu.reciprocal %61 {approx = true} : vector<2x5x1xf32> -> vector<2x5x1xf32>
    %63 = vector.broadcast %62 : vector<2x5x1xf32> to vector<2x5x5xf32>
    %64 = arith.mulf %59, %63 : vector<2x5x5xf32>
    "tpu.trace_start"() <{level = 10 : i32, message = "bij,bje->bie"}> : () -> ()
    %cst_26 = arith.constant dense<0.000000e+00> : vector<2x5x8xf32>
    %65 = tpu.matmul %64, %51, %cst_26 {dimension_numbers = #tpu.dot_dimension_numbers<[2], [1], [1], [2], [0, 0, 0, 1, 1, 2], [0], [0]>} : vector<2x5x5xf32>, vector<2x5x8xf32>, vector<2x5x8xf32> -> vector<2x5x8xf32>
    "tpu.trace_stop"() : () -> ()
    %66 = vector.extract_strided_slice %31 {offsets = [0, 0, 16], sizes = [2, 5, 8], strides = [1, 1, 1]} : vector<2x5x96xf32> to vector<2x5x8xf32>
    %67 = vector.extract_strided_slice %31 {offsets = [0, 0, 48], sizes = [2, 5, 8], strides = [1, 1, 1]} : vector<2x5x96xf32> to vector<2x5x8xf32>
    %68 = vector.extract_strided_slice %31 {offsets = [0, 0, 80], sizes = [2, 5, 8], strides = [1, 1, 1]} : vector<2x5x96xf32> to vector<2x5x8xf32>
    "tpu.trace_start"() <{level = 10 : i32, message = "bie,bje->bij"}> : () -> ()
    %cst_27 = arith.constant dense<0.000000e+00> : vector<2x5x5xf32>
    %69 = tpu.matmul %66, %67, %cst_27 {dimension_numbers = #tpu.dot_dimension_numbers<[2], [2], [1], [1], [0, 0, 0, 1, 1, 1], [0], [0]>} : vector<2x5x8xf32>, vector<2x5x8xf32>, vector<2x5x5xf32> -> vector<2x5x5xf32>
    "tpu.trace_stop"() : () -> ()
    %cst_28 = arith.constant 0.353553385 : f32
    %70 = vector.broadcast %cst_28 : f32 to vector<2x5x5xf32>
    %71 = arith.mulf %69, %70 : vector<2x5x5xf32>
    %cst_29 = arith.constant dense<0xFF800000> : vector<2x5xf32>
    %72 = vector.multi_reduction <maximumf>, %71, %cst_29 [2] : vector<2x5x5xf32> to vector<2x5xf32>
    %73 = vector.shape_cast %72 : vector<2x5xf32> to vector<2x5x1xf32>
    %74 = vector.broadcast %73 : vector<2x5x1xf32> to vector<2x5x5xf32>
    %75 = arith.subf %71, %74 : vector<2x5x5xf32>
    %76 = math.exp %75 : vector<2x5x5xf32>
    %cst_30 = arith.constant dense<0.000000e+00> : vector<2x5xf32>
    %77 = vector.multi_reduction <add>, %76, %cst_30 [2] : vector<2x5x5xf32> to vector<2x5xf32>
    %78 = vector.shape_cast %77 : vector<2x5xf32> to vector<2x5x1xf32>
    %79 = tpu.reciprocal %78 {approx = true} : vector<2x5x1xf32> -> vector<2x5x1xf32>
    %80 = vector.broadcast %79 : vector<2x5x1xf32> to vector<2x5x5xf32>
    %81 = arith.mulf %76, %80 : vector<2x5x5xf32>
    "tpu.trace_start"() <{level = 10 : i32, message = "bij,bje->bie"}> : () -> ()
    %cst_31 = arith.constant dense<0.000000e+00> : vector<2x5x8xf32>
    %82 = tpu.matmul %81, %68, %cst_31 {dimension_numbers = #tpu.dot_dimension_numbers<[2], [1], [1], [2], [0, 0, 0, 1, 1, 2], [0], [0]>} : vector<2x5x5xf32>, vector<2x5x8xf32>, vector<2x5x8xf32> -> vector<2x5x8xf32>
    "tpu.trace_stop"() : () -> ()
    %83 = vector.extract_strided_slice %31 {offsets = [0, 0, 24], sizes = [2, 5, 8], strides = [1, 1, 1]} : vector<2x5x96xf32> to vector<2x5x8xf32>
    %84 = vector.extract_strided_slice %31 {offsets = [0, 0, 56], sizes = [2, 5, 8], strides = [1, 1, 1]} : vector<2x5x96xf32> to vector<2x5x8xf32>
    %85 = vector.extract_strided_slice %31 {offsets = [0, 0, 88], sizes = [2, 5, 8], strides = [1, 1, 1]} : vector<2x5x96xf32> to vector<2x5x8xf32>
    "tpu.trace_start"() <{level = 10 : i32, message = "bie,bje->bij"}> : () -> ()
    %cst_32 = arith.constant dense<0.000000e+00> : vector<2x5x5xf32>
    %86 = tpu.matmul %83, %84, %cst_32 {dimension_numbers = #tpu.dot_dimension_numbers<[2], [2], [1], [1], [0, 0, 0, 1, 1, 1], [0], [0]>} : vector<2x5x8xf32>, vector<2x5x8xf32>, vector<2x5x5xf32> -> vector<2x5x5xf32>
    "tpu.trace_stop"() : () -> ()
    %cst_33 = arith.constant 0.353553385 : f32
    %87 = vector.broadcast %cst_33 : f32 to vector<2x5x5xf32>
    %88 = arith.mulf %86, %87 : vector<2x5x5xf32>
    %cst_34 = arith.constant dense<0xFF800000> : vector<2x5xf32>
    %89 = vector.multi_reduction <maximumf>, %88, %cst_34 [2] : vector<2x5x5xf32> to vector<2x5xf32>
    %90 = vector.shape_cast %89 : vector<2x5xf32> to vector<2x5x1xf32>
    %91 = vector.broadcast %90 : vector<2x5x1xf32> to vector<2x5x5xf32>
    %92 = arith.subf %88, %91 : vector<2x5x5xf32>
    %93 = math.exp %92 : vector<2x5x5xf32>
    %cst_35 = arith.constant dense<0.000000e+00> : vector<2x5xf32>
    %94 = vector.multi_reduction <add>, %93, %cst_35 [2] : vector<2x5x5xf32> to vector<2x5xf32>
    %95 = vector.shape_cast %94 : vector<2x5xf32> to vector<2x5x1xf32>
    %96 = tpu.reciprocal %95 {approx = true} : vector<2x5x1xf32> -> vector<2x5x1xf32>
    %97 = vector.broadcast %96 : vector<2x5x1xf32> to vector<2x5x5xf32>
    %98 = arith.mulf %93, %97 : vector<2x5x5xf32>
    "tpu.trace_start"() <{level = 10 : i32, message = "bij,bje->bie"}> : () -> ()
    %cst_36 = arith.constant dense<0.000000e+00> : vector<2x5x8xf32>
    %99 = tpu.matmul %98, %85, %cst_36 {dimension_numbers = #tpu.dot_dimension_numbers<[2], [1], [1], [2], [0, 0, 0, 1, 1, 2], [0], [0]>} : vector<2x5x5xf32>, vector<2x5x8xf32>, vector<2x5x8xf32> -> vector<2x5x8xf32>
    "tpu.trace_stop"() : () -> ()
    %100 = tpu.concatenate %48, %65, %82, %99 in 2 : vector<2x5x8xf32>, vector<2x5x8xf32>, vector<2x5x8xf32>, vector<2x5x8xf32> -> vector<2x5x32xf32>
    %101 = vector.shape_cast %100 : vector<2x5x32xf32> to vector<10x32xf32>
    %c0_37 = arith.constant 0 : index
    %c0_38 = arith.constant 0 : index
    %102 = vector.load %arg6[%c0_37, %c0_38] : memref<32x32xf32, #tpu.memory_space<vmem>>, vector<32x32xf32>
    %cst_39 = arith.constant dense<0.000000e+00> : vector<10x32xf32>
    %103 = tpu.matmul %101, %102, %cst_39 {dimension_numbers = #tpu.dot_dimension_numbers<[1], [0], [0], [1], [0, 0, 1, 1], [], []>} : vector<10x32xf32>, vector<32x32xf32>, vector<10x32xf32> -> vector<10x32xf32>
    %104 = arith.addf %4, %103 : vector<10x32xf32>
    %c0_40 = arith.constant 0 : index
    %c0_41 = arith.constant 0 : index
    %105 = vector.load %arg7[%c0_40, %c0_41] : memref<1x32xf32, #tpu.memory_space<vmem>>, vector<1x32xf32>
    %106 = vector.broadcast %105 : vector<1x32xf32> to vector<10x32xf32>
    %107 = arith.addf %104, %106 : vector<10x32xf32>
    %c0_42 = arith.constant 0 : index
    %c0_43 = arith.constant 0 : index
    %108 = vector.load %arg8[%c0_42, %c0_43] : memref<1x32xf32, #tpu.memory_space<vmem>>, vector<1x32xf32>
    %c0_44 = arith.constant 0 : index
    %c0_45 = arith.constant 0 : index
    %109 = vector.load %arg9[%c0_44, %c0_45] : memref<1x32xf32, #tpu.memory_space<vmem>>, vector<1x32xf32>
    %cst_46 = arith.constant dense<0.000000e+00> : vector<10xf32>
    %110 = vector.multi_reduction <add>, %107, %cst_46 [1] : vector<10x32xf32> to vector<10xf32>
    %111 = vector.shape_cast %110 : vector<10xf32> to vector<10x1xf32>
    %cst_47 = arith.constant 3.200000e+01 : f32
    %112 = vector.broadcast %cst_47 : f32 to vector<10x1xf32>
    %113 = arith.divf %111, %112 : vector<10x1xf32>
    %114 = vector.broadcast %113 : vector<10x1xf32> to vector<10x32xf32>
    %115 = arith.subf %107, %114 : vector<10x32xf32>
    %116 = arith.mulf %115, %115 : vector<10x32xf32>
    %cst_48 = arith.constant dense<0.000000e+00> : vector<10xf32>
    %117 = vector.multi_reduction <add>, %116, %cst_48 [1] : vector<10x32xf32> to vector<10xf32>
    %118 = vector.shape_cast %117 : vector<10xf32> to vector<10x1xf32>
    %cst_49 = arith.constant 3.200000e+01 : f32
    %119 = vector.broadcast %cst_49 : f32 to vector<10x1xf32>
    %120 = arith.divf %118, %119 : vector<10x1xf32>
    %121 = vector.broadcast %113 : vector<10x1xf32> to vector<10x32xf32>
    %122 = arith.subf %107, %121 : vector<10x32xf32>
    %cst_50 = arith.constant 9.99999974E-6 : f32
    %123 = vector.broadcast %cst_50 : f32 to vector<10x1xf32>
    %124 = arith.addf %120, %123 : vector<10x1xf32>
    %125 = math.rsqrt %124 : vector<10x1xf32>
    %126 = vector.broadcast %125 : vector<10x1xf32> to vector<10x32xf32>
    %127 = arith.mulf %122, %126 : vector<10x32xf32>
    %128 = vector.broadcast %108 : vector<1x32xf32> to vector<10x32xf32>
    %129 = arith.mulf %127, %128 : vector<10x32xf32>
    %130 = vector.broadcast %109 : vector<1x32xf32> to vector<10x32xf32>
    %131 = arith.addf %129, %130 : vector<10x32xf32>
    %c0_51 = arith.constant 0 : index
    %c0_52 = arith.constant 0 : index
    %132 = vector.load %arg10[%c0_51, %c0_52] : memref<32x64xf32, #tpu.memory_space<vmem>>, vector<32x64xf32>
    %cst_53 = arith.constant dense<0.000000e+00> : vector<10x64xf32>
    %133 = tpu.matmul %131, %132, %cst_53 {dimension_numbers = #tpu.dot_dimension_numbers<[1], [0], [0], [1], [0, 0, 1, 1], [], []>} : vector<10x32xf32>, vector<32x64xf32>, vector<10x64xf32> -> vector<10x64xf32>
    %c0_54 = arith.constant 0 : index
    %c0_55 = arith.constant 0 : index
    %134 = vector.load %arg11[%c0_54, %c0_55] : memref<1x64xf32, #tpu.memory_space<vmem>>, vector<1x64xf32>
    %135 = vector.broadcast %134 : vector<1x64xf32> to vector<10x64xf32>
    %136 = arith.addf %133, %135 : vector<10x64xf32>
    %cst_56 = arith.constant 5.000000e-01 : f32
    %137 = vector.broadcast %cst_56 : f32 to vector<10x64xf32>
    %138 = arith.mulf %137, %136 : vector<10x64xf32>
    %cst_57 = arith.constant 0.707106769 : f32
    %139 = vector.broadcast %cst_57 : f32 to vector<10x64xf32>
    %140 = arith.mulf %136, %139 : vector<10x64xf32>
    %141 = math.erf %140 : vector<10x64xf32>
    %cst_58 = arith.constant 1.000000e+00 : f32
    %142 = vector.broadcast %cst_58 : f32 to vector<10x64xf32>
    %143 = arith.addf %142, %141 : vector<10x64xf32>
    %144 = arith.mulf %138, %143 : vector<10x64xf32>
    %c0_59 = arith.constant 0 : index
    %c0_60 = arith.constant 0 : index
    %145 = vector.load %arg12[%c0_59, %c0_60] : memref<64x32xf32, #tpu.memory_space<vmem>>, vector<64x32xf32>
    %cst_61 = arith.constant dense<0.000000e+00> : vector<10x32xf32>
    %146 = tpu.matmul %144, %145, %cst_61 {dimension_numbers = #tpu.dot_dimension_numbers<[1], [0], [0], [1], [0, 0, 1, 1], [], []>} : vector<10x64xf32>, vector<64x32xf32>, vector<10x32xf32> -> vector<10x32xf32>
    %147 = arith.addf %107, %146 : vector<10x32xf32>
    %c0_62 = arith.constant 0 : index
    %c0_63 = arith.constant 0 : index
    %148 = vector.load %arg13[%c0_62, %c0_63] : memref<1x32xf32, #tpu.memory_space<vmem>>, vector<1x32xf32>
    %149 = vector.broadcast %148 : vector<1x32xf32> to vector<10x32xf32>
    %150 = arith.addf %147, %149 : vector<10x32xf32>
    %c0_64 = arith.constant 0 : index
    %c0_65 = arith.constant 0 : index
    %151 = vector.load %arg14[%c0_64, %c0_65] : memref<1x32xf32, #tpu.memory_space<vmem>>, vector<1x32xf32>
    %c0_66 = arith.constant 0 : index
    %c0_67 = arith.constant 0 : index
    %152 = vector.load %arg15[%c0_66, %c0_67] : memref<1x32xf32, #tpu.memory_space<vmem>>, vector<1x32xf32>
    %cst_68 = arith.constant dense<0.000000e+00> : vector<10xf32>
    %153 = vector.multi_reduction <add>, %150, %cst_68 [1] : vector<10x32xf32> to vector<10xf32>
    %154 = vector.shape_cast %153 : vector<10xf32> to vector<10x1xf32>
    %cst_69 = arith.constant 3.200000e+01 : f32
    %155 = vector.broadcast %cst_69 : f32 to vector<10x1xf32>
    %156 = arith.divf %154, %155 : vector<10x1xf32>
    %157 = vector.broadcast %156 : vector<10x1xf32> to vector<10x32xf32>
    %158 = arith.subf %150, %157 : vector<10x32xf32>
    %159 = arith.mulf %158, %158 : vector<10x32xf32>
    %cst_70 = arith.constant dense<0.000000e+00> : vector<10xf32>
    %160 = vector.multi_reduction <add>, %159, %cst_70 [1] : vector<10x32xf32> to vector<10xf32>
    %161 = vector.shape_cast %160 : vector<10xf32> to vector<10x1xf32>
    %cst_71 = arith.constant 3.200000e+01 : f32
    %162 = vector.broadcast %cst_71 : f32 to vector<10x1xf32>
    %163 = arith.divf %161, %162 : vector<10x1xf32>
    %164 = vector.broadcast %156 : vector<10x1xf32> to vector<10x32xf32>
    %165 = arith.subf %150, %164 : vector<10x32xf32>
    %cst_72 = arith.constant 9.99999974E-6 : f32
    %166 = vector.broadcast %cst_72 : f32 to vector<10x1xf32>
    %167 = arith.addf %163, %166 : vector<10x1xf32>
    %168 = math.rsqrt %167 : vector<10x1xf32>
    %169 = vector.broadcast %168 : vector<10x1xf32> to vector<10x32xf32>
    %170 = arith.mulf %165, %169 : vector<10x32xf32>
    %171 = vector.broadcast %151 : vector<1x32xf32> to vector<10x32xf32>
    %172 = arith.mulf %170, %171 : vector<10x32xf32>
    %173 = vector.broadcast %152 : vector<1x32xf32> to vector<10x32xf32>
    %174 = arith.addf %172, %173 : vector<10x32xf32>
    %c0_73 = arith.constant 0 : index
    %c0_74 = arith.constant 0 : index
    %175 = vector.load %arg16[%c0_73, %c0_74] : memref<32x96xf32, #tpu.memory_space<vmem>>, vector<32x96xf32>
    %cst_75 = arith.constant dense<0.000000e+00> : vector<10x96xf32>
    %176 = tpu.matmul %174, %175, %cst_75 {dimension_numbers = #tpu.dot_dimension_numbers<[1], [0], [0], [1], [0, 0, 1, 1], [], []>} : vector<10x32xf32>, vector<32x96xf32>, vector<10x96xf32> -> vector<10x96xf32>
    %177 = vector.shape_cast %176 : vector<10x96xf32> to vector<2x5x96xf32>
    %178 = vector.extract_strided_slice %177 {offsets = [0, 0, 0], sizes = [2, 5, 8], strides = [1, 1, 1]} : vector<2x5x96xf32> to vector<2x5x8xf32>
    %179 = vector.extract_strided_slice %177 {offsets = [0, 0, 32], sizes = [2, 5, 8], strides = [1, 1, 1]} : vector<2x5x96xf32> to vector<2x5x8xf32>
    %180 = vector.extract_strided_slice %177 {offsets = [0, 0, 64], sizes = [2, 5, 8], strides = [1, 1, 1]} : vector<2x5x96xf32> to vector<2x5x8xf32>
    "tpu.trace_start"() <{level = 10 : i32, message = "bie,bje->bij"}> : () -> ()
    %cst_76 = arith.constant dense<0.000000e+00> : vector<2x5x5xf32>
    %181 = tpu.matmul %178, %179, %cst_76 {dimension_numbers = #tpu.dot_dimension_numbers<[2], [2], [1], [1], [0, 0, 0, 1, 1, 1], [0], [0]>} : vector<2x5x8xf32>, vector<2x5x8xf32>, vector<2x5x5xf32> -> vector<2x5x5xf32>
    "tpu.trace_stop"() : () -> ()
    %cst_77 = arith.constant 0.353553385 : f32
    %182 = vector.broadcast %cst_77 : f32 to vector<2x5x5xf32>
    %183 = arith.mulf %181, %182 : vector<2x5x5xf32>
    %cst_78 = arith.constant dense<0xFF800000> : vector<2x5xf32>
    %184 = vector.multi_reduction <maximumf>, %183, %cst_78 [2] : vector<2x5x5xf32> to vector<2x5xf32>
    %185 = vector.shape_cast %184 : vector<2x5xf32> to vector<2x5x1xf32>
    %186 = vector.broadcast %185 : vector<2x5x1xf32> to vector<2x5x5xf32>
    %187 = arith.subf %183, %186 : vector<2x5x5xf32>
    %188 = math.exp %187 : vector<2x5x5xf32>
    %cst_79 = arith.constant dense<0.000000e+00> : vector<2x5xf32>
    %189 = vector.multi_reduction <add>, %188, %cst_79 [2] : vector<2x5x5xf32> to vector<2x5xf32>
    %190 = vector.shape_cast %189 : vector<2x5xf32> to vector<2x5x1xf32>
    %191 = tpu.reciprocal %190 {approx = true} : vector<2x5x1xf32> -> vector<2x5x1xf32>
    %192 = vector.broadcast %191 : vector<2x5x1xf32> to vector<2x5x5xf32>
    %193 = arith.mulf %188, %192 : vector<2x5x5xf32>
    "tpu.trace_start"() <{level = 10 : i32, message = "bij,bje->bie"}> : () -> ()
    %cst_80 = arith.constant dense<0.000000e+00> : vector<2x5x8xf32>
    %194 = tpu.matmul %193, %180, %cst_80 {dimension_numbers = #tpu.dot_dimension_numbers<[2], [1], [1], [2], [0, 0, 0, 1, 1, 2], [0], [0]>} : vector<2x5x5xf32>, vector<2x5x8xf32>, vector<2x5x8xf32> -> vector<2x5x8xf32>
    "tpu.trace_stop"() : () -> ()
    %195 = vector.extract_strided_slice %177 {offsets = [0, 0, 8], sizes = [2, 5, 8], strides = [1, 1, 1]} : vector<2x5x96xf32> to vector<2x5x8xf32>
    %196 = vector.extract_strided_slice %177 {offsets = [0, 0, 40], sizes = [2, 5, 8], strides = [1, 1, 1]} : vector<2x5x96xf32> to vector<2x5x8xf32>
    %197 = vector.extract_strided_slice %177 {offsets = [0, 0, 72], sizes = [2, 5, 8], strides = [1, 1, 1]} : vector<2x5x96xf32> to vector<2x5x8xf32>
    "tpu.trace_start"() <{level = 10 : i32, message = "bie,bje->bij"}> : () -> ()
    %cst_81 = arith.constant dense<0.000000e+00> : vector<2x5x5xf32>
    %198 = tpu.matmul %195, %196, %cst_81 {dimension_numbers = #tpu.dot_dimension_numbers<[2], [2], [1], [1], [0, 0, 0, 1, 1, 1], [0], [0]>} : vector<2x5x8xf32>, vector<2x5x8xf32>, vector<2x5x5xf32> -> vector<2x5x5xf32>
    "tpu.trace_stop"() : () -> ()
    %cst_82 = arith.constant 0.353553385 : f32
    %199 = vector.broadcast %cst_82 : f32 to vector<2x5x5xf32>
    %200 = arith.mulf %198, %199 : vector<2x5x5xf32>
    %cst_83 = arith.constant dense<0xFF800000> : vector<2x5xf32>
    %201 = vector.multi_reduction <maximumf>, %200, %cst_83 [2] : vector<2x5x5xf32> to vector<2x5xf32>
    %202 = vector.shape_cast %201 : vector<2x5xf32> to vector<2x5x1xf32>
    %203 = vector.broadcast %202 : vector<2x5x1xf32> to vector<2x5x5xf32>
    %204 = arith.subf %200, %203 : vector<2x5x5xf32>
    %205 = math.exp %204 : vector<2x5x5xf32>
    %cst_84 = arith.constant dense<0.000000e+00> : vector<2x5xf32>
    %206 = vector.multi_reduction <add>, %205, %cst_84 [2] : vector<2x5x5xf32> to vector<2x5xf32>
    %207 = vector.shape_cast %206 : vector<2x5xf32> to vector<2x5x1xf32>
    %208 = tpu.reciprocal %207 {approx = true} : vector<2x5x1xf32> -> vector<2x5x1xf32>
    %209 = vector.broadcast %208 : vector<2x5x1xf32> to vector<2x5x5xf32>
    %210 = arith.mulf %205, %209 : vector<2x5x5xf32>
    "tpu.trace_start"() <{level = 10 : i32, message = "bij,bje->bie"}> : () -> ()
    %cst_85 = arith.constant dense<0.000000e+00> : vector<2x5x8xf32>
    %211 = tpu.matmul %210, %197, %cst_85 {dimension_numbers = #tpu.dot_dimension_numbers<[2], [1], [1], [2], [0, 0, 0, 1, 1, 2], [0], [0]>} : vector<2x5x5xf32>, vector<2x5x8xf32>, vector<2x5x8xf32> -> vector<2x5x8xf32>
    "tpu.trace_stop"() : () -> ()
    %212 = vector.extract_strided_slice %177 {offsets = [0, 0, 16], sizes = [2, 5, 8], strides = [1, 1, 1]} : vector<2x5x96xf32> to vector<2x5x8xf32>
    %213 = vector.extract_strided_slice %177 {offsets = [0, 0, 48], sizes = [2, 5, 8], strides = [1, 1, 1]} : vector<2x5x96xf32> to vector<2x5x8xf32>
    %214 = vector.extract_strided_slice %177 {offsets = [0, 0, 80], sizes = [2, 5, 8], strides = [1, 1, 1]} : vector<2x5x96xf32> to vector<2x5x8xf32>
    "tpu.trace_start"() <{level = 10 : i32, message = "bie,bje->bij"}> : () -> ()
    %cst_86 = arith.constant dense<0.000000e+00> : vector<2x5x5xf32>
    %215 = tpu.matmul %212, %213, %cst_86 {dimension_numbers = #tpu.dot_dimension_numbers<[2], [2], [1], [1], [0, 0, 0, 1, 1, 1], [0], [0]>} : vector<2x5x8xf32>, vector<2x5x8xf32>, vector<2x5x5xf32> -> vector<2x5x5xf32>
    "tpu.trace_stop"() : () -> ()
    %cst_87 = arith.constant 0.353553385 : f32
    %216 = vector.broadcast %cst_87 : f32 to vector<2x5x5xf32>
    %217 = arith.mulf %215, %216 : vector<2x5x5xf32>
    %cst_88 = arith.constant dense<0xFF800000> : vector<2x5xf32>
    %218 = vector.multi_reduction <maximumf>, %217, %cst_88 [2] : vector<2x5x5xf32> to vector<2x5xf32>
    %219 = vector.shape_cast %218 : vector<2x5xf32> to vector<2x5x1xf32>
    %220 = vector.broadcast %219 : vector<2x5x1xf32> to vector<2x5x5xf32>
    %221 = arith.subf %217, %220 : vector<2x5x5xf32>
    %222 = math.exp %221 : vector<2x5x5xf32>
    %cst_89 = arith.constant dense<0.000000e+00> : vector<2x5xf32>
    %223 = vector.multi_reduction <add>, %222, %cst_89 [2] : vector<2x5x5xf32> to vector<2x5xf32>
    %224 = vector.shape_cast %223 : vector<2x5xf32> to vector<2x5x1xf32>
    %225 = tpu.reciprocal %224 {approx = true} : vector<2x5x1xf32> -> vector<2x5x1xf32>
    %226 = vector.broadcast %225 : vector<2x5x1xf32> to vector<2x5x5xf32>
    %227 = arith.mulf %222, %226 : vector<2x5x5xf32>
    "tpu.trace_start"() <{level = 10 : i32, message = "bij,bje->bie"}> : () -> ()
    %cst_90 = arith.constant dense<0.000000e+00> : vector<2x5x8xf32>
    %228 = tpu.matmul %227, %214, %cst_90 {dimension_numbers = #tpu.dot_dimension_numbers<[2], [1], [1], [2], [0, 0, 0, 1, 1, 2], [0], [0]>} : vector<2x5x5xf32>, vector<2x5x8xf32>, vector<2x5x8xf32> -> vector<2x5x8xf32>
    "tpu.trace_stop"() : () -> ()
    %229 = vector.extract_strided_slice %177 {offsets = [0, 0, 24], sizes = [2, 5, 8], strides = [1, 1, 1]} : vector<2x5x96xf32> to vector<2x5x8xf32>
    %230 = vector.extract_strided_slice %177 {offsets = [0, 0, 56], sizes = [2, 5, 8], strides = [1, 1, 1]} : vector<2x5x96xf32> to vector<2x5x8xf32>
    %231 = vector.extract_strided_slice %177 {offsets = [0, 0, 88], sizes = [2, 5, 8], strides = [1, 1, 1]} : vector<2x5x96xf32> to vector<2x5x8xf32>
    "tpu.trace_start"() <{level = 10 : i32, message = "bie,bje->bij"}> : () -> ()
    %cst_91 = arith.constant dense<0.000000e+00> : vector<2x5x5xf32>
    %232 = tpu.matmul %229, %230, %cst_91 {dimension_numbers = #tpu.dot_dimension_numbers<[2], [2], [1], [1], [0, 0, 0, 1, 1, 1], [0], [0]>} : vector<2x5x8xf32>, vector<2x5x8xf32>, vector<2x5x5xf32> -> vector<2x5x5xf32>
    "tpu.trace_stop"() : () -> ()
    %cst_92 = arith.constant 0.353553385 : f32
    %233 = vector.broadcast %cst_92 : f32 to vector<2x5x5xf32>
    %234 = arith.mulf %232, %233 : vector<2x5x5xf32>
    %cst_93 = arith.constant dense<0xFF800000> : vector<2x5xf32>
    %235 = vector.multi_reduction <maximumf>, %234, %cst_93 [2] : vector<2x5x5xf32> to vector<2x5xf32>
    %236 = vector.shape_cast %235 : vector<2x5xf32> to vector<2x5x1xf32>
    %237 = vector.broadcast %236 : vector<2x5x1xf32> to vector<2x5x5xf32>
    %238 = arith.subf %234, %237 : vector<2x5x5xf32>
    %239 = math.exp %238 : vector<2x5x5xf32>
    %cst_94 = arith.constant dense<0.000000e+00> : vector<2x5xf32>
    %240 = vector.multi_reduction <add>, %239, %cst_94 [2] : vector<2x5x5xf32> to vector<2x5xf32>
    %241 = vector.shape_cast %240 : vector<2x5xf32> to vector<2x5x1xf32>
    %242 = tpu.reciprocal %241 {approx = true} : vector<2x5x1xf32> -> vector<2x5x1xf32>
    %243 = vector.broadcast %242 : vector<2x5x1xf32> to vector<2x5x5xf32>
    %244 = arith.mulf %239, %243 : vector<2x5x5xf32>
    "tpu.trace_start"() <{level = 10 : i32, message = "bij,bje->bie"}> : () -> ()
    %cst_95 = arith.constant dense<0.000000e+00> : vector<2x5x8xf32>
    %245 = tpu.matmul %244, %231, %cst_95 {dimension_numbers = #tpu.dot_dimension_numbers<[2], [1], [1], [2], [0, 0, 0, 1, 1, 2], [0], [0]>} : vector<2x5x5xf32>, vector<2x5x8xf32>, vector<2x5x8xf32> -> vector<2x5x8xf32>
    "tpu.trace_stop"() : () -> ()
    %246 = tpu.concatenate %194, %211, %228, %245 in 2 : vector<2x5x8xf32>, vector<2x5x8xf32>, vector<2x5x8xf32>, vector<2x5x8xf32> -> vector<2x5x32xf32>
    %247 = vector.shape_cast %246 : vector<2x5x32xf32> to vector<10x32xf32>
    %c0_96 = arith.constant 0 : index
    %c0_97 = arith.constant 0 : index
    %248 = vector.load %arg17[%c0_96, %c0_97] : memref<32x32xf32, #tpu.memory_space<vmem>>, vector<32x32xf32>
    %cst_98 = arith.constant dense<0.000000e+00> : vector<10x32xf32>
    %249 = tpu.matmul %247, %248, %cst_98 {dimension_numbers = #tpu.dot_dimension_numbers<[1], [0], [0], [1], [0, 0, 1, 1], [], []>} : vector<10x32xf32>, vector<32x32xf32>, vector<10x32xf32> -> vector<10x32xf32>
    %250 = arith.addf %150, %249 : vector<10x32xf32>
    %c0_99 = arith.constant 0 : index
    %c0_100 = arith.constant 0 : index
    %251 = vector.load %arg18[%c0_99, %c0_100] : memref<1x32xf32, #tpu.memory_space<vmem>>, vector<1x32xf32>
    %252 = vector.broadcast %251 : vector<1x32xf32> to vector<10x32xf32>
    %253 = arith.addf %250, %252 : vector<10x32xf32>
    %c0_101 = arith.constant 0 : index
    %c0_102 = arith.constant 0 : index
    %254 = vector.load %arg19[%c0_101, %c0_102] : memref<1x32xf32, #tpu.memory_space<vmem>>, vector<1x32xf32>
    %c0_103 = arith.constant 0 : index
    %c0_104 = arith.constant 0 : index
    %255 = vector.load %arg20[%c0_103, %c0_104] : memref<1x32xf32, #tpu.memory_space<vmem>>, vector<1x32xf32>
    %cst_105 = arith.constant dense<0.000000e+00> : vector<10xf32>
    %256 = vector.multi_reduction <add>, %253, %cst_105 [1] : vector<10x32xf32> to vector<10xf32>
    %257 = vector.shape_cast %256 : vector<10xf32> to vector<10x1xf32>
    %cst_106 = arith.constant 3.200000e+01 : f32
    %258 = vector.broadcast %cst_106 : f32 to vector<10x1xf32>
    %259 = arith.divf %257, %258 : vector<10x1xf32>
    %260 = vector.broadcast %259 : vector<10x1xf32> to vector<10x32xf32>
    %261 = arith.subf %253, %260 : vector<10x32xf32>
    %262 = arith.mulf %261, %261 : vector<10x32xf32>
    %cst_107 = arith.constant dense<0.000000e+00> : vector<10xf32>
    %263 = vector.multi_reduction <add>, %262, %cst_107 [1] : vector<10x32xf32> to vector<10xf32>
    %264 = vector.shape_cast %263 : vector<10xf32> to vector<10x1xf32>
    %cst_108 = arith.constant 3.200000e+01 : f32
    %265 = vector.broadcast %cst_108 : f32 to vector<10x1xf32>
    %266 = arith.divf %264, %265 : vector<10x1xf32>
    %267 = vector.broadcast %259 : vector<10x1xf32> to vector<10x32xf32>
    %268 = arith.subf %253, %267 : vector<10x32xf32>
    %cst_109 = arith.constant 9.99999974E-6 : f32
    %269 = vector.broadcast %cst_109 : f32 to vector<10x1xf32>
    %270 = arith.addf %266, %269 : vector<10x1xf32>
    %271 = math.rsqrt %270 : vector<10x1xf32>
    %272 = vector.broadcast %271 : vector<10x1xf32> to vector<10x32xf32>
    %273 = arith.mulf %268, %272 : vector<10x32xf32>
    %274 = vector.broadcast %254 : vector<1x32xf32> to vector<10x32xf32>
    %275 = arith.mulf %273, %274 : vector<10x32xf32>
    %276 = vector.broadcast %255 : vector<1x32xf32> to vector<10x32xf32>
    %277 = arith.addf %275, %276 : vector<10x32xf32>
    %c0_110 = arith.constant 0 : index
    %c0_111 = arith.constant 0 : index
    %278 = vector.load %arg21[%c0_110, %c0_111] : memref<32x64xf32, #tpu.memory_space<vmem>>, vector<32x64xf32>
    %cst_112 = arith.constant dense<0.000000e+00> : vector<10x64xf32>
    %279 = tpu.matmul %277, %278, %cst_112 {dimension_numbers = #tpu.dot_dimension_numbers<[1], [0], [0], [1], [0, 0, 1, 1], [], []>} : vector<10x32xf32>, vector<32x64xf32>, vector<10x64xf32> -> vector<10x64xf32>
    %c0_113 = arith.constant 0 : index
    %c0_114 = arith.constant 0 : index
    %280 = vector.load %arg22[%c0_113, %c0_114] : memref<1x64xf32, #tpu.memory_space<vmem>>, vector<1x64xf32>
    %281 = vector.broadcast %280 : vector<1x64xf32> to vector<10x64xf32>
    %282 = arith.addf %279, %281 : vector<10x64xf32>
    %cst_115 = arith.constant 5.000000e-01 : f32
    %283 = vector.broadcast %cst_115 : f32 to vector<10x64xf32>
    %284 = arith.mulf %283, %282 : vector<10x64xf32>
    %cst_116 = arith.constant 0.707106769 : f32
    %285 = vector.broadcast %cst_116 : f32 to vector<10x64xf32>
    %286 = arith.mulf %282, %285 : vector<10x64xf32>
    %287 = math.erf %286 : vector<10x64xf32>
    %cst_117 = arith.constant 1.000000e+00 : f32
    %288 = vector.broadcast %cst_117 : f32 to vector<10x64xf32>
    %289 = arith.addf %288, %287 : vector<10x64xf32>
    %290 = arith.mulf %284, %289 : vector<10x64xf32>
    %c0_118 = arith.constant 0 : index
    %c0_119 = arith.constant 0 : index
    %291 = vector.load %arg23[%c0_118, %c0_119] : memref<64x32xf32, #tpu.memory_space<vmem>>, vector<64x32xf32>
    %cst_120 = arith.constant dense<0.000000e+00> : vector<10x32xf32>
    %292 = tpu.matmul %290, %291, %cst_120 {dimension_numbers = #tpu.dot_dimension_numbers<[1], [0], [0], [1], [0, 0, 1, 1], [], []>} : vector<10x64xf32>, vector<64x32xf32>, vector<10x32xf32> -> vector<10x32xf32>
    %293 = arith.addf %253, %292 : vector<10x32xf32>
    %c0_121 = arith.constant 0 : index
    %c0_122 = arith.constant 0 : index
    %294 = vector.load %arg24[%c0_121, %c0_122] : memref<1x32xf32, #tpu.memory_space<vmem>>, vector<1x32xf32>
    %295 = vector.broadcast %294 : vector<1x32xf32> to vector<10x32xf32>
    %296 = arith.addf %293, %295 : vector<10x32xf32>
    %297 = vector.shape_cast %296 : vector<10x32xf32> to vector<2x5x32xf32>
    %298 = vector.extract_strided_slice %297 {offsets = [0, 0, 0], sizes = [2, 1, 32], strides = [1, 1, 1]} : vector<2x5x32xf32> to vector<2x1x32xf32>
    %299 = vector.shape_cast %298 : vector<2x1x32xf32> to vector<2x32xf32>
    %c0_123 = arith.constant 0 : index
    %c0_124 = arith.constant 0 : index
    %300 = vector.load %arg25[%c0_123, %c0_124] : memref<1x32xf32, #tpu.memory_space<vmem>>, vector<1x32xf32>
    %c0_125 = arith.constant 0 : index
    %c0_126 = arith.constant 0 : index
    %301 = vector.load %arg26[%c0_125, %c0_126] : memref<1x32xf32, #tpu.memory_space<vmem>>, vector<1x32xf32>
    %cst_127 = arith.constant dense<0.000000e+00> : vector<2xf32>
    %302 = vector.multi_reduction <add>, %299, %cst_127 [1] : vector<2x32xf32> to vector<2xf32>
    %303 = vector.shape_cast %302 : vector<2xf32> to vector<2x1xf32>
    %cst_128 = arith.constant 3.200000e+01 : f32
    %304 = vector.broadcast %cst_128 : f32 to vector<2x1xf32>
    %305 = arith.divf %303, %304 : vector<2x1xf32>
    %306 = vector.broadcast %305 : vector<2x1xf32> to vector<2x32xf32>
    %307 = arith.subf %299, %306 : vector<2x32xf32>
    %308 = arith.mulf %307, %307 : vector<2x32xf32>
    %cst_129 = arith.constant dense<0.000000e+00> : vector<2xf32>
    %309 = vector.multi_reduction <add>, %308, %cst_129 [1] : vector<2x32xf32> to vector<2xf32>
    %310 = vector.shape_cast %309 : vector<2xf32> to vector<2x1xf32>
    %cst_130 = arith.constant 3.200000e+01 : f32
    %311 = vector.broadcast %cst_130 : f32 to vector<2x1xf32>
    %312 = arith.divf %310, %311 : vector<2x1xf32>
    %313 = vector.broadcast %305 : vector<2x1xf32> to vector<2x32xf32>
    %314 = arith.subf %299, %313 : vector<2x32xf32>
    %cst_131 = arith.constant 9.99999974E-6 : f32
    %315 = vector.broadcast %cst_131 : f32 to vector<2x1xf32>
    %316 = arith.addf %312, %315 : vector<2x1xf32>
    %317 = math.rsqrt %316 : vector<2x1xf32>
    %318 = vector.broadcast %317 : vector<2x1xf32> to vector<2x32xf32>
    %319 = arith.mulf %314, %318 : vector<2x32xf32>
    %320 = vector.broadcast %300 : vector<1x32xf32> to vector<2x32xf32>
    %321 = arith.mulf %319, %320 : vector<2x32xf32>
    %322 = vector.broadcast %301 : vector<1x32xf32> to vector<2x32xf32>
    %323 = arith.addf %321, %322 : vector<2x32xf32>
    %c0_132 = arith.constant 0 : index
    %c0_133 = arith.constant 0 : index
    %324 = vector.load %arg27[%c0_132, %c0_133] : memref<32x128xf32, #tpu.memory_space<vmem>>, vector<32x128xf32>
    %cst_134 = arith.constant dense<0.000000e+00> : vector<2x128xf32>
    %325 = tpu.matmul %323, %324, %cst_134 {dimension_numbers = #tpu.dot_dimension_numbers<[1], [0], [0], [1], [0, 0, 1, 1], [], []>} : vector<2x32xf32>, vector<32x128xf32>, vector<2x128xf32> -> vector<2x128xf32>
    %c0_135 = arith.constant 0 : index
    %c0_136 = arith.constant 0 : index
    %326 = vector.load %arg28[%c0_135, %c0_136] : memref<1x128xf32, #tpu.memory_space<vmem>>, vector<1x128xf32>
    %327 = vector.broadcast %326 : vector<1x128xf32> to vector<2x128xf32>
    %328 = arith.addf %325, %327 : vector<2x128xf32>
    %c0_137 = arith.constant 0 : index
    %c0_138 = arith.constant 0 : index
    %329 = vector.load %arg29[%c0_137, %c0_138] : memref<2x128xf32, #tpu.memory_space<vmem>>, vector<2x128xf32>
    tpu.vector_store %arg29[%c0_137, %c0_138], %328 {strides = array<i32>} : memref<2x128xf32, #tpu.memory_space<vmem>>, vector<2x128xf32>,
    return
  }
}

</mosaic_0001>

<bundles_post_ra>
// kernel: tile.9
= control target key start
LH: loop header
LB: loop body
LE: loop exit
PB: predicated region body
PF: predicated region fallthrough
CT: control target
= control target key end

     0   :  { %vm3_vm0 = vcmask 261120   ;;  %s34_s0 = inlined_call_operand.vmem [shape: f32[2,5,32], index: 0, kind: input, shape index: {}]   ;;  %s35_s1 = inlined_call_operand.vmem [shape: f32[10,32], index: 1, kind: output, shape index: {}]  }
   0x1   :  { %v2_v0 = vld [vmem:[%s34_s0] sm:$0x1f]   ;;  %v10_v1 = vld [vmem:[%s34_s0 + $0x8] sm:$0x1f]  }
   0x2   :  { %4 = vst.msk [vmem:[%s35_s1] sm:$0x1f] %vm3_vm0, %v2_v0   ;;  %11 = vst.msk [vmem:[%s35_s1 + $0x5] sm:$0x1f] %vm3_vm0, %v10_v1  }

// kernel: vit_forward.1
= control target key start
LH: loop header
LB: loop body
LE: loop exit
PB: predicated region body
PF: predicated region fallthrough
CT: control target
= control target key end

     0   :  { %s5594_s6 = smov 1   ;;  %s5595_s10 = smov 2   ;;  %s6417_s0 = inlined_call_operand.smem [shape: u32[30], index: -1, kind: input, shape index: {}] }
   0x1   :  { %s5650_s5 = sld [smem:[%s6417_s0]]   ;;  %s5596_s14 = smov 3  }
   0x2   :  { %s5655_s9 = sld [smem:[%s6417_s0 + %s5594_s6]]   ;;  %s5597_s18 = smov 4  }
   0x3   :  { %s5660_s13 = sld [smem:[%s6417_s0 + %s5595_s10]]   ;;  %s5598_s22 = smov 5  }
   0x4   :  { %s5665_s17 = sld [smem:[%s6417_s0 + %s5596_s14]]   ;;  %s5599_s26 = smov 6  }
   0x5   :  { %s5670_s21 = sld [smem:[%s6417_s0 + %s5597_s18]]   ;;  %s5600_s30 = smov 7  }
   0x6   :  { %s5675_s25 = sld [smem:[%s6417_s0 + %s5598_s22]]   ;;  %s5601_s4 = smov 8  }
   0x7   :  { %s5680_s29 = sld [smem:[%s6417_s0 + %s5599_s26]]   ;;  %s5602_s10 = smov 9  }
   0x8   :  { %s5685_s3 = sld [smem:[%s6417_s0 + %s5600_s30]]   ;;  %s5603_s15 = smov 10  }
   0x9   :  { %s5690_s8 = sld [smem:[%s6417_s0 + %s5601_s4]]   ;;  %s5604_s20 = smov 11  }
   0xa   :  { %s5695_s14 = sld [smem:[%s6417_s0 + %s5602_s10]]   ;;  %s5605_s26 = smov 12  }
   0xb   :  { %s5700_s19 = sld [smem:[%s6417_s0 + %s5603_s15]]   ;;  %s5606_s1 = smov 13  }
   0xc   :  { %s5705_s24 = sld [smem:[%s6417_s0 + %s5604_s20]]   ;;  %s5607_s7 = smov 14  }
   0xd   :  { %s5710_s30 = sld [smem:[%s6417_s0 + %s5605_s26]]   ;;  %s5608_s15 = smov 15  }
   0xe   :  { %s5715_s6 = sld [smem:[%s6417_s0 + %s5606_s1]]   ;;  %s5609_s22 = smov 16  }
   0xf   :  { %s5720_s12 = sld [smem:[%s6417_s0 + %s5607_s7]]   ;;  %s5610_s28 = smov 17  }
  0x10   :  { %s5725_s20 = sld [smem:[%s6417_s0 + %s5608_s15]]   ;;  %s5611_s7 = smov 18  }
  0x11   :  { %s5730_s27 = sld [smem:[%s6417_s0 + %s5609_s22]]   ;;  %s5612_s15 = smov 19  }
  0x12   :  { %s5735_s4 = sld [smem:[%s6417_s0 + %s5610_s28]]   ;;  %s5613_s22 = smov 20  }
  0x13   :  { %s5614_s28 = smov 21  }
  0x15   :  { %6422 = sst [smem:[#allocation5_spill]] %s5720_s12 }
  0x16   :  { %6423 = sst [smem:[#allocation6_spill]] %s5725_s20 }
  0x17   :  { %6424 = sst [smem:[#allocation7_spill]] %s5730_s27 }
  0x18   :  { %6425 = sst [smem:[#allocation8_spill]] %s5735_s4 }
  0x19   :  { %s5740_s12 = sld [smem:[%s6417_s0 + %s5611_s7]]   ;;  %s5615_s7 = smov 22  }
  0x1a   :  { %s5745_s20 = sld [smem:[%s6417_s0 + %s5612_s15]]   ;;  %s5616_s15 = smov 23  }
  0x1b   :  { %s5750_s27 = sld [smem:[%s6417_s0 + %s5613_s22]]   ;;  %s5617_s22 = smov 24  }
  0x1c   :  { %s5755_s4 = sld [smem:[%s6417_s0 + %s5614_s28]]   ;;  %s5618_s28 = smov 25  }
  0x1f   :  { %6426 = sst [smem:[#allocation9_spill]] %s5740_s12 }
  0x20   :  { %6427 = sst [smem:[#allocation10_spill]] %s5745_s20 }
  0x21   :  { %6428 = sst [smem:[#allocation11_spill]] %s5750_s27 }
  0x22   :  { %6429 = sst [smem:[#allocation12_spill]] %s5755_s4 }
  0x23   :  { %s5760_s12 = sld [smem:[%s6417_s0 + %s5615_s7]]   ;;  %s5619_s7 = smov 26  }
  0x24   :  { %s5765_s20 = sld [smem:[%s6417_s0 + %s5616_s15]]   ;;  %s5620_s15 = smov 27  }
  0x25   :  { %s5770_s27 = sld [smem:[%s6417_s0 + %s5617_s22]]   ;;  %s5621_s22 = smov 28  }
  0x26   :  { %s5775_s4 = sld [smem:[%s6417_s0 + %s5618_s28]]   ;;  %s5622_s28 = smov 29  }
  0x29   :  { %6430 = sst [smem:[#allocation13_spill]] %s5760_s12 }
  0x2a   :  { %6431 = sst [smem:[#allocation14_spill]] %s5765_s20 }
  0x2b   :  { %6432 = sst [smem:[#allocation15_spill]] %s5770_s27 }
  0x2c   :  { %6433 = sst [smem:[#allocation16_spill]] %s5775_s4 }
  0x2d   :  { %s5780_s12 = sld [smem:[%s6417_s0 + %s5619_s7]]  }
  0x2e   :  { %s5785_s20 = sld [smem:[%s6417_s0 + %s5620_s15]]  }
  0x2f   :  { %s5790_s27 = sld [smem:[%s6417_s0 + %s5621_s22]]  }
  0x30   :  { %s5795_s4 = sld [smem:[%s6417_s0 + %s5622_s28]]  }
  0x31   :  { %v127_v0 = vld [vmem:[%s5660_s13] sm:$0xff]  ;;  %v128_v1 = vld [vmem:[%s5660_s13 + $0x8] sm:$0xff]  ;;  %v129_v2 = vld [vmem:[%s5660_s13 + $0x10] sm:$0xff]  ;;  %v5623_v3 = vmov 0.0|0.0   ;;  %vm153_vm0 = vcmask 523264  }
  0x32   :  { %5310 = vmatprep.subr.bf16.mxu0 %v5623_v3  ;;  %v5311_v4 = vpack.c.bf16 %v128_v1, %v127_v0  ;;  %v130_v5 = vld [vmem:[%s5660_s13 + $0x18] sm:$0xff]  ;;  %v131_v7 = vld [vmem:[%s5660_s13 + $0x20] sm:$0xff]  ;;  %v132_v8 = vld [vmem:[%s5660_s13 + $0x28] sm:$0xff] }
  0x33   :  { %v5314_v6 = vpack.c.bf16 %v130_v5, %v129_v2  ;;  %v5317_v9 = vpack.c.bf16 %v132_v8, %v131_v7  ;;  %v133_v10 = vld [vmem:[%s5660_s13 + $0x30] sm:$0xff]  ;;  %v134_v11 = vld [vmem:[%s5660_s13 + $0x38] sm:$0xff]  ;;  %v124_v12 = vld [vmem:[%s5650_s5 + $0x8] sm:$0xff] }
  0x34   :  { %5312 = vmatpush1.bf16.msra.mxu0 %v5311_v4  ;;  %4806 = vmatprep.mubr.msk.f32.mxu0 %vm153_vm0, %v124_v12 }
  0x35   :  { %5313 = vmatprep.subr.bf16.mxu0 %v5623_v3 }
  0x38   :  { %5315 = vmatpush1.bf16.msra.mxu0 %v5314_v6 }
  0x39   :  { %5316 = vmatprep.subr.bf16.mxu0 %v5623_v3 }
  0x3a   :  { %64 = vsyncpa [#allocation3], 0  ;;  %v5320_v13 = vpack.c.bf16 %v134_v11, %v133_v10  ;;  %v135_v14 = vld [vmem:[%s5660_s13 + $0x40] sm:$0xff]  ;;  %v136_v15 = vld [vmem:[%s5660_s13 + $0x48] sm:$0xff]  ;;  %vm237_vm1 = vcmask 261120   ;;  %vm241_vm2 = vcmask 254976  }
  0x3b   :  { %v5323_v16 = vpack.c.bf16 %v136_v15, %v135_v14  ;;  %v137_v17 = vld [vmem:[%s5660_s13 + $0x50] sm:$0xff]  ;;  %v138_v18 = vld [vmem:[%s5660_s13 + $0x58] sm:$0xff]  ;;  %v139_v20 = vld [vmem:[%s5660_s13 + $0x60] sm:$0xff]  ;;  %vm5626_vm3 = vmmov 0   ;;  %s5627_s0 = smov 96   ;;  %vm481_vm4 = vcmask 64512  }
  0x3c   :  { %5318 = vmatpush1.bf16.msra.mxu0 %v5317_v9  ;;  %v5326_v19 = vpack.c.bf16 %v138_v18, %v137_v17  ;;  %v140_v21 = vld [vmem:[%s5660_s13 + $0x68] sm:$0xff]  ;;  %v141_v23 = vld [vmem:[%s5660_s13 + $0x70] sm:$0xff]  ;;  %v142_v24 = vld [vmem:[%s5660_s13 + $0x78] sm:$0xff]  ;;  %vm673_vm5 = vcmask 36864   ;;  %vm702_vm6 = vcmask 1044480   ;;  %vm698_vm7 = vcmask 39936  }
  0x3d   :  { %5319 = vmatprep.subr.bf16.mxu0 %v5623_v3  ;;  %v5329_v22 = vpack.c.bf16 %v140_v21, %v139_v20  ;;  %v5332_v25 = vpack.c.bf16 %v142_v24, %v141_v23  ;;  %v143_v26 = vld [vmem:[%s5660_s13 + $0x80] sm:$0xff]  ;;  %v144_v27 = vld [vmem:[%s5660_s13 + $0x88] sm:$0xff]  ;;  %v145_v29 = vld [vmem:[%s5660_s13 + $0x90] sm:$0xff]  ;;  %v5624_v20 = vmov 0.0   ;;  %v5625_v21 = vmov 1966171168  }
  0x3e   :  { %v5335_v28 = vpack.c.bf16 %v144_v27, %v143_v26  ;;  %v146_v30 = vld [vmem:[%s5660_s13 + $0x98] sm:$0xff]  ;;  %v147_v32 = vld [vmem:[%s5660_s13 + $0xa0] sm:$0xff]  ;;  %v148_v33 = vld [vmem:[%s5660_s13 + $0xa8] sm:$0xff]  ;;  %v373_v23 = vlaneseq  ;;  %s5634_s7 = smov 48   ;;  %s5635_s10 = smov 72   ;;  %vm1883_vm8 = vcmask 195584  }
  0x3f   :  { %v5338_v31 = vpack.c.bf16 %v146_v30, %v145_v29  ;;  %v5341_v34 = vpack.c.bf16 %v148_v33, %v147_v32  ;;  %v149_v35 = vld [vmem:[%s5660_s13 + $0xb0] sm:$0xff]  ;;  %v150_v36 = vld [vmem:[%s5660_s13 + $0xb8] sm:$0xff]  ;;  %v123_v38 = vld [vmem:[%s5650_s5] sm:$0xff]  ;;  %s5630_s13 = smov 120   ;;  %s5636_s11 = smov 104   ;;  %vm1880_vm9 = vcmask 130048  }
  0x40   :  { %5321 = vmatpush1.bf16.msra.mxu0 %v5320_v13  ;;  %v5344_v37 = vpack.c.bf16 %v150_v36, %v149_v35  ;;  %v126_v39 = vld [vmem:[%s5650_s5 + $0x18] sm:$0x3]  ;;  %v125_v40 = vld [vmem:[%s5650_s5 + $0x10] sm:$0x3]  ;;  %v151_v41 = vld [vmem:[%s5655_s9] sm:$0xff]  ;;  %s5628_s5 = smov 64  }
  0x41   :  { %5322 = vmatprep.subr.bf16.mxu0 %v5623_v3  ;;  %v152_v45 = vld [vmem:[%s5655_s9 + $0x8] sm:$0x3]  ;;  %v282_v61 = vld [vmem:[%s5675_s25] sm:$0xff]  ;;  %v284_v63 = vld [vmem:[%s5675_s25 + $0x10] sm:$0xff]  ;;  %s5629_s9 = smov 88   ;;  %s5637_s15 = smov 40  }
  0x42   :  { %v283_v62 = vld [vmem:[%s5675_s25 + $0x8] sm:$0xff]  ;;  %v285_v1 = vld [vmem:[%s5675_s25 + $0x18] sm:$0xff]  ;;  %v4808_v11 = vld [vmem:[%s5665_s17] ss:$0 sm:$0xff]  ;;  %s5631_s17 = smov 56   ;;  %s5633_s25 = smov 112  }
  0x43   :  { %v5346_v0 = vpack.c.bf16 %v283_v62, %v282_v61  ;;  %v5350_v2 = vpack.c.bf16 %v285_v1, %v284_v63  ;;  %v4809_v13 = vld [vmem:[%s5670_s21] ss:$0 sm:$0xff]  ;;  %s5632_s21 = smov 80   ;;  %s5638_s16 = smov 8  }
  0x44   :  { %5324 = vmatpush1.bf16.msra.mxu0 %v5323_v16  ;;  %s5639_s18 = smov 16   ;;  %s5640_s22 = smov 24  }
  0x45   :  { %5325 = vmatprep.subr.bf16.mxu0 %v5623_v3  ;;  %5347 = vmatprep.subr.bf16.mxu1 %v5346_v0  ;;  %s6442_s23 = sld [smem:[#allocation14_spill]]  ;;  %s6443_s26 = sld [smem:[#allocation13_spill]] }
  0x46   :  { %5349 = vmatpush3.bf16.msra.mxu1 %v5346_v0  ;;  %s6444_s28 = sld [smem:[#allocation15_spill]]  ;;  %s6445_s1 = sld [smem:[#allocation16_spill]] }
  0x47   :  { %5351 = vmatprep.subr.bf16.mxu1 %v5350_v2 }
  0x48   :  { %5327 = vmatpush1.bf16.msra.mxu0 %v5326_v19 }
  0x49   :  { %5328 = vmatprep.subr.bf16.mxu0 %v5623_v3 }
  0x4a   :  { %5353 = vmatpush3.bf16.msra.mxu1 %v5350_v2 }
  0x4b   :  { %5046 = vmatprep.subr.mxu1 %v5624_v20 }
  0x4c   :  { %5330 = vmatpush1.bf16.msra.mxu0 %v5329_v22  ;;  %v371_v22 = vunpack.c.l.s4 %v5625_v21 }
  0x4d   :  { %5331 = vmatprep.subr.bf16.mxu0 %v5623_v3 }
  0x4e   :  { %v372_v24 = vunpack.c.0.s8 %v371_v22 }
  0x50   :  { %5333 = vmatpush1.bf16.msra.mxu0 %v5332_v25  ;;  %v5863_v25 = vshrl.u32 %v373_v23, 7 }
  0x51   :  { %5334 = vmatprep.subr.bf16.mxu0 %v5623_v3 }
  0x52   :  { %v5866_v26 = vsub.s32 %v372_v24, %v5863_v25 }
  0x54   :  { %5336 = vmatpush1.bf16.msra.mxu0 %v5335_v28 }
  0x55   :  { %5337 = vmatprep.subr.bf16.mxu0 %v5623_v3 }
  0x58   :  { %5339 = vmatpush1.bf16.msra.mxu0 %v5338_v31 }
  0x59   :  { %5340 = vmatprep.subr.bf16.mxu0 %v5623_v3 }
  0x5c   :  { %5342 = vmatpush1.bf16.msra.mxu0 %v5341_v34 }
  0x5d   :  { %5343 = vmatprep.subr.bf16.mxu0 %v5623_v3 }
  0x60   :  { %5345 = vmatpush1.bf16.msra.mxu0 %v5344_v37 }
  0x61   :  { %5101 = vmatprep.subr.mxu0 %v5624_v20 }
  0x63   :  { %225 = vmatmul.mubr.f32.vlgmr.msra.gmra.mrb[0].mxu0 %v123_v38 }
  0x64   :  { %4807 = vmatprep.mubr.msk.f32.mxu0 %vm153_vm0, %v126_v39 }
  0x67   :  { %230 = vmatmul.mubr.f32.gmra.mrb[2].mxu0 %v125_v40 }
  0x68   :  { %5103 = vmatprep.mubr.msk.f32.mxu0 %vm5626_vm3, %v5624_v20 }
 0x136   :  { %v226_v42 = vpop.f32.mrb[0].mxu0 }
 0x137   :  { %v5840_v43 = vadd.f32 %v226_v42, %v151_v41  ;;  %v228_v44 = vpop.f32.mrb[1].mxu0 }
 0x139   :  { %v238_v46 = vsel %vm237_vm1, %v5840_v43, 0.0 }
 0x13a   :  { %v231_v47 = vpop.f32.mrb[2].mxu0  ;;  %239 = vadd.xlane.f32.xlu0 %v238_v46 }
 0x13b   :  { %v5845_v48 = vadd.f32 %v231_v47, %v152_v45  ;;  %v233_v49 = vpop.f32.mrb[3].mxu0 }
 0x13d   :  { %v242_v50 = vsel %vm241_vm2, %v5845_v48, 0.0 }
 0x13e   :  { %243 = vadd.xlane.f32.xlu0 %v242_v50 }
 0x1c7   :  { %v240_v51 = vpop.xlane.xlu0 %239 }
 0x1c8   :  { %v246_v52 = vmul.f32 0.03125, %v240_v51 }
 0x1ca   :  { %v248_v53 = vsub.f32 %v5840_v43, %v246_v52 }
 0x1cb   :  { %v244_v54 = vpop.xlane.xlu0 %243 }
 0x1cc   :  { %v247_v55 = vmul.f32 0.03125, %v244_v54  ;;  %v250_v56 = vmul.f32 %v248_v53, %v248_v53 }
 0x1ce   :  { %v249_v57 = vsub.f32 %v5845_v48, %v247_v55  ;;  %v252_v58 = vsel %vm237_vm1, %v250_v56, 0.0 }
 0x1cf   :  { %253 = vadd.xlane.f32.xlu1 %v252_v58 }
 0x1d0   :  { %v251_v59 = vmul.f32 %v249_v57, %v249_v57 }
 0x1d2   :  { %v255_v60 = vsel %vm241_vm2, %v251_v59, 0.0 }
 0x1d3   :  { %256 = vadd.xlane.f32.xlu1 %v255_v60 }
 0x25c   :  { %v254_v4 = vpop.xlane.xlu1 %253 }
 0x25d   :  { %v258_v5 = vmul.f32 0.03125, %v254_v4 }
 0x25f   :  { %v260_v6 = vadd.f32 1e-05, %v258_v5 }
 0x260   :  { %v257_v7 = vpop.xlane.xlu1 %256 }
 0x261   :  { %5480 = vrsqrt.f32 %v260_v6  ;;  %v259_v8 = vmul.f32 0.03125, %v257_v7 }
 0x263   :  { %v261_v9 = vadd.f32 1e-05, %v259_v8 }
 0x265   :  { %5482 = vrsqrt.f32 %v261_v9 }
 0x26b   :  { %v5481_v10 = vpop.eup %5480 }
 0x26c   :  { %v264_v12 = vmul.f32 %v5481_v10, %v248_v53 }
 0x26e   :  { %v272_v14 = vmul.f32 %v4808_v11, %v264_v12 }
 0x26f   :  { %v5483_v15 = vpop.eup %5482 }
 0x270   :  { %v265_v16 = vmul.f32 %v5483_v15, %v249_v57  ;;  %v280_v17 = vadd.f32 %v4809_v13, %v272_v14 }
 0x272   :  { %v273_v18 = vmul.f32 %v4808_v11, %v265_v16  ;;  %5043 = vmatprep.mubr.msk.f32.mxu1 %vm237_vm1, %v280_v17 }
 0x274   :  { %v281_v19 = vadd.f32 %v4809_v13, %v273_v18 }
 0x276   :  { %5044 = vmatmul.mubr.msk.f32.vlgmr.msra.gmra.mrb[0].mxu1 %vm237_vm1, %v281_v19 }
 0x277   :  { %5048 = vmatprep.mubr.msk.f32.mxu1 %vm5626_vm3, %v5624_v20 }
 0x349   :  { %v5045_v27 = vpop.f32.mrb[0].mxu1 }
 0x34a   :  { %v424_v28 = vrot.slane %v5045_v27, %v5866_v26  ;;  %v358_v29 = vpop.f32.mrb[1].mxu1 }
 0x34b   :  { %v369_v30 = vcombine.high %v358_v29, %v358_v29  ;;  %v376_v31 = vrot.slane %v358_v29, %v5866_v26 }
 0x34c   :  { %v425_v34 = vcombine.high %v424_v28, %v424_v28  ;;  %v432_v44 = vrot.slane %v424_v28, %v5866_v26 }
 0x34d   :  { %v383_v32 = vrot.slane %v369_v30, %v5866_v26  ;;  %v384_v33 = vcombine.high %v376_v31, %v376_v31  ;;  %v392_v35 = vrot.slane %v376_v31, %v5866_v26 }
 0x34e   :  { %v439_v45 = vrot.slane %v425_v34, %v5866_v26 }
 0x34f   :  { %v385_v36 = vcombine.high %v383_v32, %v383_v32  ;;  %v399_v37 = vrot.slane %v383_v32, %v5866_v26  ;;  %v406_v38 = vrot.slane %v384_v33, %v5866_v26 }
 0x350   :  { %v578_v54 = vrot.slane %v439_v45, %v5866_v26 }
 0x351   :  { %v413_v39 = vrot.slane %v385_v36, %v5866_v26  ;;  %v415_v40 = vcombine.high %v399_v37, %v399_v37  ;;  %v440_v41 = vcombine.low %v392_v35, %v406_v38  ;;  %v4812_v42 = vcombine.high %v392_v35, %v406_v38 }
 0x352   :  { %v462_v46 = vrot.slane %v399_v37, %v5866_v26  ;;  %v593_v61 = vrot.slane %v578_v54, %v5866_v26 }
 0x353   :  { %v417_v47 = vcombine.high %v413_v39, %v413_v39  ;;  %v448_v49 = vrot.slane %v440_v41, %v5866_v26  ;;  %v455_v50 = vrot.slane %v4812_v42, %v5866_v26  ;;  %v556_v51 = vcombine.low %v413_v39, %v415_v40 }
 0x354   :  { %v477_v56 = vrot.slane %v462_v46, %v5866_v26 }
 0x355   :  { %v463_v52 = vcombine.low %v448_v49, %v455_v50  ;;  %v557_v53 = vcombine.low %v417_v47, %v432_v44  ;;  %v564_v57 = vrot.slane %v556_v51, %v5866_v26 }
 0x357   :  { %v470_v55 = vrot.slane %v463_v52, %v5866_v26  ;;  %v571_v58 = vrot.slane %v557_v53, %v5866_v26 }
 0x359   :  { %v5889_v59 = vcombine.low %v470_v55, %v477_v56  ;;  %v579_v60 = vcombine.low %v564_v57, %v571_v58 }
 0x35b   :  { %v586_v62 = vrot.slane %v579_v60, %v5866_v26  ;;  %479 = vrot.lane.b32.xlu0 %v5889_v59, %s5627_s0 }
 0x35d   :  { %v5895_v63 = vcombine.low %v586_v62, %v593_v61 }
 0x35f   :  { %595 = vrot.lane.b32.xlu1 %v5895_v63, %s5627_s0 }
 0x3cd   :  { %v480_v0 = vpop.permute.xlu0 %479 }
 0x3ce   :  { %5047 = vmatpush3.xpose.msk.msra.mxu1 %vm481_vm4, %v480_v0 }
 0x3cf   :  { %5051 = vmatprep.subr.mxu1 %v5624_v20 }
 0x3d1   :  { %5049 = vmatmul.mubr.msk.f32.vlgmr.msra.gmra.mrb[2].mxu1 %vm481_vm4, %v5889_v59  ;;  %v596_v1 = vpop.permute.xlu1 %595 }
 0x3d2   :  { %5052 = vmatpush3.xpose.msk.msra.mxu1 %vm481_vm4, %v596_v1  ;;  %5053 = vmatprep.mubr.msk.f32.mxu1 %vm5626_vm3, %v5624_v20 }
 0x3d3   :  { %5056 = vmatprep.subr.mxu1 %v5624_v20 }
 0x3d5   :  { %5054 = vmatmul.mubr.msk.f32.vlgmr.msra.gmra.mrb[4].mxu1 %vm481_vm4, %v5895_v63 }
 0x3d6   :  { %5058 = vmatprep.mubr.msk.f32.mxu1 %vm5626_vm3, %v5624_v20 }
 0x4a4   :  { %v552_v2 = vpop.f32.mrb[2].mxu1 }
 0x4a5   :  { %v671_v4 = vmul.f32 0.35355338, %v552_v2  ;;  %v5050_v5 = vpop.f32.mrb[3].mxu1 }
 0x4a7   :  { %v674_v6 = vsel %vm673_vm5, %v671_v4, -inf }
 0x4a8   :  { %675 = vmax.xlane.f32.xlu1 %v674_v6  ;;  %v667_v7 = vpop.f32.mrb[4].mxu1 }
 0x4a9   :  { %v672_v8 = vmul.f32 0.35355338, %v667_v7  ;;  %v5055_v9 = vpop.f32.mrb[5].mxu1 }
 0x4ab   :  { %v677_v10 = vsel %vm673_vm5, %v672_v8, -inf }
 0x4ac   :  { %678 = vmax.xlane.f32.xlu0 %v677_v10 }
 0x4b9   :  { %775 = vrot.lane.b32.xlu1 %v5895_v63, %s5628_s5 }
 0x4bd   :  { %854 = vrot.lane.b32.xlu1 %v5889_v59, %s5629_s9 }
 0x535   :  { %v676_v11 = vpop.xlane.xlu1 %675 }
 0x536   :  { %v680_v12 = vsub.f32 %v671_v4, %v676_v11 }
 0x538   :  { %v682_v13 = vmul.f32 1.442695, %v680_v12 }
 0x539   :  { %v679_v14 = vpop.xlane.xlu0 %678  ;;  %v776_v22 = vpop.permute.xlu1 %775 }
 0x53a   :  { %5484 = vpow2.f32 %v682_v13  ;;  %v681_v15 = vsub.f32 %v672_v8, %v679_v14 }
 0x53c   :  { %v684_v16 = vmul.f32 1.442695, %v681_v15 }
 0x53d   :  { %v855_v23 = vpop.permute.xlu1 %854 }
 0x53e   :  { %5486 = vpow2.f32 %v684_v16 }
 0x544   :  { %v5485_v17 = vpop.eup %5484 }
 0x545   :  { %v686_v18 = vsel %vm673_vm5, %v5485_v17, 0.0 }
 0x546   :  { %687 = vadd.xlane.f32.xlu0 %v686_v18 }
 0x548   :  { %v5487_v19 = vpop.eup %5486 }
 0x549   :  { %v689_v21 = vsel %vm673_vm5, %v5487_v19, 0.0 }
 0x54a   :  { %690 = vadd.xlane.f32.xlu1 %v689_v21 }
 0x55b   :  { %852 = vrot.lane.b32.xlu1 %v5889_v59, %s5630_s13 }
 0x55c   :  { %696 = vrot.lane.b32.xlu0 %v5889_v59, %s5628_s5 }
 0x55f   :  { %930 = vrot.lane.b32.xlu1 %v5895_v63, %s5630_s13 }
 0x560   :  { %932 = vrot.lane.b32.xlu0 %v5895_v63, %s5629_s9 }
 0x5d3   :  { %v688_v24 = vpop.xlane.xlu0 %687 }
 0x5d4   :  { %5488 = vrcp.f32 %v688_v24 }
 0x5d7   :  { %v697_v27 = vpop.permute.xlu0 %696  ;;  %v691_v28 = vpop.xlane.xlu1 %690 }
 0x5d8   :  { %5490 = vrcp.f32 %v691_v28  ;;  %5057 = vmatpush3.msk.msra.mxu1 %vm702_vm6, %v697_v27 }
 0x5d9   :  { %5061 = vmatprep.subr.mxu1 %v5624_v20 }
 0x5db   :  { %v853_v33 = vpop.permute.xlu1 %852  ;;  %v933_v34 = vpop.permute.xlu0 %932 }
 0x5de   :  { %v5489_v29 = vpop.eup %5488 }
 0x5df   :  { %v694_v30 = vmul.f32 %v5489_v29, %v5485_v17  ;;  %v931_v35 = vpop.permute.xlu1 %930 }
 0x5e1   :  { %5059 = vmatmul.mubr.msk.f32.vlgmr.msra.gmra.mrb[6].mxu1 %vm698_vm7, %v694_v30 }
 0x5e2   :  { %v5491_v31 = vpop.eup %5490  ;;  %5062 = vmatpush3.msk.msra.mxu1 %vm702_vm6, %v776_v22  ;;  %5063 = vmatprep.mubr.msk.f32.mxu1 %vm5626_vm3, %v5624_v20 }
 0x5e3   :  { %v695_v32 = vmul.f32 %v5491_v31, %v5487_v19  ;;  %5066 = vmatprep.subr.mxu1 %v5624_v20 }
 0x5e5   :  { %5064 = vmatmul.mubr.msk.f32.vlgmr.msra.gmra.mrb[8].mxu1 %vm698_vm7, %v695_v32 }
 0x5e6   :  { %5068 = vmatprep.mubr.msk.f32.mxu1 %vm5626_vm3, %v5624_v20 }
 0x5e9   :  { %5067 = vmatpush3.xpose.msk.msra.mxu1 %vm481_vm4, %v855_v23 }
 0x5ea   :  { %5071 = vmatprep.subr.mxu1 %v5624_v20 }
 0x5ec   :  { %5069 = vmatmul.mubr.msk.f32.vlgmr.msra.gmra.mrb[10].mxu1 %vm481_vm4, %v853_v33 }
 0x5ed   :  { %5072 = vmatpush3.xpose.msk.msra.mxu1 %vm481_vm4, %v933_v34  ;;  %5073 = vmatprep.mubr.msk.f32.mxu1 %vm5626_vm3, %v5624_v20 }
 0x5ee   :  { %5076 = vmatprep.subr.mxu1 %v5624_v20 }
 0x5f0   :  { %5074 = vmatmul.mubr.msk.f32.vlgmr.msra.gmra.mrb[12].mxu1 %vm481_vm4, %v931_v35 }
 0x5f1   :  { %5078 = vmatprep.mubr.msk.f32.mxu1 %vm5626_vm3, %v5624_v20 }
 0x6b4   :  { %v5947_v36 = vpop.f32.mrb[6].mxu1 }
 0x6b5   :  { %v5060_v37 = vpop.f32.mrb[7].mxu1 }
 0x6b8   :  { %v5949_v38 = vpop.f32.mrb[8].mxu1 }
 0x6b9   :  { %v5065_v39 = vpop.f32.mrb[9].mxu1 }
 0x6bf   :  { %v926_v40 = vpop.f32.mrb[10].mxu1 }
 0x6c0   :  { %v1008_v41 = vmul.f32 0.35355338, %v926_v40  ;;  %v5070_v42 = vpop.f32.mrb[11].mxu1 }
 0x6c2   :  { %v1010_v44 = vsel %vm673_vm5, %v1008_v41, -inf }
 0x6c3   :  { %1011 = vmax.xlane.f32.xlu0 %v1010_v44  ;;  %v1004_v45 = vpop.f32.mrb[12].mxu1 }
 0x6c4   :  { %v1009_v46 = vmul.f32 0.35355338, %v1004_v45  ;;  %v5075_v47 = vpop.f32.mrb[13].mxu1 }
 0x6c6   :  { %v1013_v49 = vsel %vm673_vm5, %v1009_v46, -inf }
 0x6c7   :  { %1014 = vmax.xlane.f32.xlu1 %v1013_v49 }
 0x6d8   :  { %1109 = vrot.lane.b32.xlu1 %v5895_v63, %s5631_s17 }
 0x6dc   :  { %1188 = vrot.lane.b32.xlu1 %v5889_v59, %s5632_s21 }
 0x6e0   :  { %1186 = vrot.lane.b32.xlu1 %v5889_v59, %s5633_s25 }
 0x6e4   :  { %1264 = vrot.lane.b32.xlu1 %v5895_v63, %s5633_s25 }
 0x750   :  { %v1012_v50 = vpop.xlane.xlu0 %1011 }
 0x751   :  { %v1016_v51 = vsub.f32 %v1008_v41, %v1012_v50 }
 0x753   :  { %v1018_v52 = vmul.f32 1.442695, %v1016_v51 }
 0x754   :  { %v1015_v53 = vpop.xlane.xlu1 %1014 }
 0x755   :  { %5492 = vpow2.f32 %v1018_v52  ;;  %v1017_v54 = vsub.f32 %v1009_v46, %v1015_v53 }
 0x757   :  { %v1020_v55 = vmul.f32 1.442695, %v1017_v54 }
 0x758   :  { %v1110_v1 = vpop.permute.xlu1 %1109 }
 0x759   :  { %5494 = vpow2.f32 %v1020_v55 }
 0x75c   :  { %v1189_v6 = vpop.permute.xlu1 %1188 }
 0x75f   :  { %v5493_v56 = vpop.eup %5492 }
 0x760   :  { %v1022_v57 = vsel %vm673_vm5, %v5493_v56, 0.0  ;;  %v1187_v8 = vpop.permute.xlu1 %1186 }
 0x761   :  { %1023 = vadd.xlane.f32.xlu0 %v1022_v57 }
 0x763   :  { %v5495_v58 = vpop.eup %5494 }
 0x764   :  { %v1025_v60 = vsel %vm673_vm5, %v5495_v58, 0.0  ;;  %v1265_v10 = vpop.permute.xlu1 %1264 }
 0x765   :  { %1026 = vadd.xlane.f32.xlu0 %v1025_v60 }
 0x77b   :  { %1032 = vrot.lane.b32.xlu0 %v5889_v59, %s5631_s17 }
 0x77f   :  { %1266 = vrot.lane.b32.xlu0 %v5895_v63, %s5632_s21 }
 0x7ee   :  { %v1024_v61 = vpop.xlane.xlu0 %1023 }
 0x7ef   :  { %5496 = vrcp.f32 %v1024_v61 }
 0x7f2   :  { %v1027_v62 = vpop.xlane.xlu0 %1026 }
 0x7f3   :  { %5498 = vrcp.f32 %v1027_v62 }
 0x7f6   :  { %v1033_v0 = vpop.permute.xlu0 %1032 }
 0x7f7   :  { %5077 = vmatpush3.msk.msra.mxu1 %vm702_vm6, %v1033_v0 }
 0x7f8   :  { %5081 = vmatprep.subr.mxu1 %v5624_v20 }
 0x7f9   :  { %v5497_v2 = vpop.eup %5496 }
 0x7fa   :  { %v1030_v4 = vmul.f32 %v5497_v2, %v5493_v56  ;;  %v1267_v9 = vpop.permute.xlu0 %1266 }
 0x7fc   :  { %5079 = vmatmul.mubr.msk.f32.vlgmr.msra.gmra.mrb[14].mxu1 %vm698_vm7, %v1030_v4 }
 0x7fd   :  { %v5499_v5 = vpop.eup %5498  ;;  %5082 = vmatpush3.msk.msra.mxu1 %vm702_vm6, %v1110_v1  ;;  %5083 = vmatprep.mubr.msk.f32.mxu1 %vm5626_vm3, %v5624_v20 }
 0x7fe   :  { %v1031_v7 = vmul.f32 %v5499_v5, %v5495_v58  ;;  %5086 = vmatprep.subr.mxu1 %v5624_v20 }
 0x800   :  { %5084 = vmatmul.mubr.msk.f32.vlgmr.msra.gmra.mrb[16].mxu1 %vm698_vm7, %v1031_v7 }
 0x801   :  { %5088 = vmatprep.mubr.msk.f32.mxu1 %vm5626_vm3, %v5624_v20 }
 0x804   :  { %5087 = vmatpush3.xpose.msk.msra.mxu1 %vm481_vm4, %v1189_v6 }
 0x805   :  { %5091 = vmatprep.subr.mxu1 %v5624_v20 }
 0x807   :  { %5089 = vmatmul.mubr.msk.f32.vlgmr.msra.gmra.mrb[18].mxu1 %vm481_vm4, %v1187_v8 }
 0x808   :  { %5092 = vmatpush3.xpose.msk.msra.mxu1 %vm481_vm4, %v1267_v9  ;;  %5093 = vmatprep.mubr.msk.f32.mxu1 %vm5626_vm3, %v5624_v20 }
 0x809   :  { %5096 = vmatprep.subr.mxu1 %v5624_v20 }
 0x80b   :  { %5094 = vmatmul.mubr.msk.f32.vlgmr.msra.gmra.mrb[20].mxu1 %vm481_vm4, %v1265_v10 }
 0x80c   :  { %5098 = vmatprep.mubr.msk.f32.mxu1 %vm5626_vm3, %v5624_v20 }
 0x8cf   :  { %v5987_v11 = vpop.f32.mrb[14].mxu1 }
 0x8d0   :  { %v5080_v12 = vpop.f32.mrb[15].mxu1 }
 0x8d3   :  { %v5989_v13 = vpop.f32.mrb[16].mxu1 }
 0x8d4   :  { %v5085_v14 = vpop.f32.mrb[17].mxu1 }
 0x8da   :  { %v1260_v15 = vpop.f32.mrb[18].mxu1 }
 0x8db   :  { %v1342_v16 = vmul.f32 0.35355338, %v1260_v15  ;;  %v5090_v17 = vpop.f32.mrb[19].mxu1 }
 0x8dd   :  { %v1344_v18 = vsel %vm673_vm5, %v1342_v16, -inf }
 0x8de   :  { %1345 = vmax.xlane.f32.xlu0 %v1344_v18  ;;  %v1338_v19 = vpop.f32.mrb[20].mxu1 }
 0x8df   :  { %v1343_v21 = vmul.f32 0.35355338, %v1338_v19  ;;  %v5095_v22 = vpop.f32.mrb[21].mxu1 }
 0x8e0   :  { %v1967_v22 = vld [vmem:[%s5680_s29 + $0x8] sm:$0xff] }
 0x8e1   :  { %v1347_v23 = vsel %vm673_vm5, %v1343_v21, -inf }
 0x8e2   :  { %1348 = vmax.xlane.f32.xlu1 %v1347_v23 }
 0x8f3   :  { %1443 = vrot.lane.b32.xlu1 %v5895_v63, %s5634_s7 }
 0x8f4   :  { %1366 = vrot.lane.b32.xlu0 %v5889_v59, %s5634_s7 }
 0x8f7   :  { %1522 = vrot.lane.b32.xlu1 %v5889_v59, %s5635_s10 }
 0x8fb   :  { %1600 = vrot.lane.b32.xlu1 %v5895_v63, %s5635_s10 }
 0x8ff   :  { %1598 = vrot.lane.b32.xlu1 %v5895_v63, %s5636_s11 }
 0x96b   :  { %v1346_v24 = vpop.xlane.xlu0 %1345 }
 0x96c   :  { %v1350_v27 = vsub.f32 %v1342_v16, %v1346_v24 }
 0x96e   :  { %v1352_v28 = vmul.f32 1.442695, %v1350_v27 }
 0x96f   :  { %v1367_v29 = vpop.permute.xlu0 %1366  ;;  %v1349_v30 = vpop.xlane.xlu1 %1348 }
 0x970   :  { %5500 = vpow2.f32 %v1352_v28  ;;  %v1351_v31 = vsub.f32 %v1343_v21, %v1349_v30  ;;  %5097 = vmatpush3.msk.msra.mxu1 %vm702_vm6, %v1367_v29  ;;  %v1966_v21 = vld [vmem:[%s5680_s29] sm:$0xff]  ;;  %v1968_v28 = vld [vmem:[%s5680_s29 + $0x10] sm:$0xff]  ;;  %v1969_v29 = vld [vmem:[%s5680_s29 + $0x18] sm:$0xff]  ;;  %s6434_s29 = sld [smem:[#allocation7_spill]] }
 0x971   :  { %5106 = vmatprep.subr.mxu1 %v5624_v20  ;;  %v5354_v24 = vpack.c.bf16 %v1967_v22, %v1966_v21 }
 0x972   :  { %v1354_v32 = vmul.f32 1.442695, %v1351_v31  ;;  %v5358_v31 = vpack.c.bf16 %v1969_v29, %v1968_v28 }
 0x973   :  { %v1444_v33 = vpop.permute.xlu1 %1443 }
 0x974   :  { %5502 = vpow2.f32 %v1354_v32  ;;  %5102 = vmatpush3.msk.msra.mxu0 %vm702_vm6, %v1444_v33 }
 0x975   :  { %5111 = vmatprep.subr.mxu0 %v5624_v20 }
 0x977   :  { %v1523_v42 = vpop.permute.xlu1 %1522 }
 0x97a   :  { %v5501_v34 = vpop.eup %5500 }
 0x97b   :  { %v1356_v35 = vsel %vm673_vm5, %v5501_v34, 0.0  ;;  %v1601_v47 = vpop.permute.xlu1 %1600 }
 0x97c   :  { %1357 = vadd.xlane.f32.xlu0 %v1356_v35 }
 0x97e   :  { %v5503_v37 = vpop.eup %5502 }
 0x97f   :  { %v1359_v39 = vsel %vm673_vm5, %v5503_v37, 0.0  ;;  %v1599_v51 = vpop.permute.xlu1 %1598 }
 0x980   :  { %1360 = vadd.xlane.f32.xlu0 %v1359_v39 }
 0x996   :  { %1520 = vrot.lane.b32.xlu0 %v5889_v59, %s5636_s11 }
 0xa09   :  { %v1358_v40 = vpop.xlane.xlu0 %1357 }
 0xa0a   :  { %5504 = vrcp.f32 %v1358_v40 }
 0xa0d   :  { %v1361_v41 = vpop.xlane.xlu0 %1360 }
 0xa0e   :  { %5506 = vrcp.f32 %v1361_v41 }
 0xa11   :  { %v1521_v50 = vpop.permute.xlu0 %1520 }
 0xa14   :  { %v5505_v44 = vpop.eup %5504 }
 0xa15   :  { %v1364_v45 = vmul.f32 %v5505_v44, %v5501_v34 }
 0xa17   :  { %5099 = vmatmul.mubr.msk.f32.vlgmr.msra.gmra.mrb[22].mxu1 %vm698_vm7, %v1364_v45 }
 0xa18   :  { %v5507_v46 = vpop.eup %5506  ;;  %5107 = vmatpush3.xpose.msk.msra.mxu1 %vm481_vm4, %v1523_v42  ;;  %5108 = vmatprep.mubr.msk.f32.mxu1 %vm5626_vm3, %v5624_v20 }
 0xa19   :  { %v1365_v49 = vmul.f32 %v5507_v46, %v5503_v37  ;;  %5116 = vmatprep.subr.mxu1 %v5624_v20 }
 0xa1b   :  { %5104 = vmatmul.mubr.msk.f32.vlgmr.msra.gmra.mrb[4].mxu0 %vm698_vm7, %v1365_v49  ;;  %5109 = vmatmul.mubr.msk.f32.vlgmr.msra.gmra.mrb[24].mxu1 %vm481_vm4, %v1521_v50 }
 0xa1c   :  { %5112 = vmatpush3.xpose.msk.msra.mxu0 %vm481_vm4, %v1601_v47  ;;  %5113 = vmatprep.mubr.msk.f32.mxu0 %vm5626_vm3, %v5624_v20 }
 0xa1d   :  { %5121 = vmatprep.subr.mxu0 %v5624_v20  ;;  %5118 = vmatprep.mubr.msk.f32.mxu1 %vm5626_vm3, %v5624_v20 }
 0xa1f   :  { %5114 = vmatmul.mubr.msk.f32.vlgmr.msra.gmra.mrb[6].mxu0 %vm481_vm4, %v1599_v51 }
 0xa20   :  { %5123 = vmatprep.mubr.msk.f32.mxu0 %vm5626_vm3, %v5624_v20 }
 0xaea   :  { %v1439_v52 = vpop.f32.mrb[22].mxu1 }
 0xaeb   :  { %v5100_v53 = vpop.f32.mrb[23].mxu1 }
 0xaee   :  { %v1516_v54 = vpop.f32.mrb[4].mxu0  ;;  %v1594_v55 = vpop.f32.mrb[24].mxu1 }
 0xaef   :  { %v1676_v56 = vmul.f32 0.35355338, %v1594_v55  ;;  %v5105_v57 = vpop.f32.mrb[5].mxu0  ;;  %v5110_v58 = vpop.f32.mrb[25].mxu1 }
 0xaf1   :  { %v1678_v60 = vsel %vm673_vm5, %v1676_v56, -inf }
 0xaf2   :  { %v1672_v61 = vpop.f32.mrb[6].mxu0  ;;  %1679 = vmax.xlane.f32.xlu0 %v1678_v60 }
 0xaf3   :  { %v1677_v62 = vmul.f32 0.35355338, %v1672_v61  ;;  %v5115_v0 = vpop.f32.mrb[7].mxu0 }
 0xaf5   :  { %v1681_v1 = vsel %vm673_vm5, %v1677_v62, -inf }
 0xaf6   :  { %1682 = vmax.xlane.f32.xlu1 %v1681_v1 }
 0xb07   :  { %1777 = vrot.lane.b32.xlu1 %v5895_v63, %s5637_s15 }
 0xb0b   :  { %1856 = vrot.lane.b32.xlu1 %v5987_v11, %s5638_s16 }
 0xb0f   :  { %1858 = vrot.lane.b32.xlu1 %v5989_v13, %s5638_s16 }
 0xb13   :  { %1866 = vrot.lane.b32.xlu1 %v1516_v54, %s5639_s18 }
 0xb7f   :  { %v1680_v2 = vpop.xlane.xlu0 %1679 }
 0xb80   :  { %v1684_v4 = vsub.f32 %v1676_v56, %v1680_v2 }
 0xb82   :  { %v1686_v5 = vmul.f32 1.442695, %v1684_v4 }
 0xb83   :  { %v1683_v6 = vpop.xlane.xlu1 %1682 }
 0xb84   :  { %5508 = vpow2.f32 %v1686_v5  ;;  %v1685_v7 = vsub.f32 %v1677_v62, %v1683_v6 }
 0xb86   :  { %v1688_v8 = vmul.f32 1.442695, %v1685_v7 }
 0xb87   :  { %v1778_v9 = vpop.permute.xlu1 %1777 }
 0xb88   :  { %5510 = vpow2.f32 %v1688_v8  ;;  %5122 = vmatpush3.msk.msra.mxu0 %vm702_vm6, %v1778_v9 }
 0xb8b   :  { %v1857_v32 = vpop.permute.xlu1 %1856 }
 0xb8c   :  { %v1878_v35 = vsel %vm481_vm4, %v5947_v36, %v1857_v32 }
 0xb8e   :  { %v5509_v63 = vpop.eup %5508 }
 0xb8f   :  { %v1690_v10 = vsel %vm673_vm5, %v5509_v63, 0.0  ;;  %v1859_v33 = vpop.permute.xlu1 %1858 }
 0xb90   :  { %1691 = vadd.xlane.f32.xlu0 %v1690_v10  ;;  %v1879_v45 = vsel %vm481_vm4, %v5949_v38, %v1859_v33 }
 0xb92   :  { %v5511_v11 = vpop.eup %5510 }
 0xb93   :  { %v1693_v12 = vsel %vm673_vm5, %v5511_v11, 0.0  ;;  %v1867_v37 = vpop.permute.xlu1 %1866 }
 0xb94   :  { %1694 = vadd.xlane.f32.xlu0 %v1693_v12  ;;  %v1882_v46 = vsel %vm1880_vm9, %v1879_v45, %v1867_v37  ;;  %v2169_v37 = vld [vmem:[%s5700_s19 + $0x8] sm:$0xff] }
 0xbaa   :  { %1700 = vrot.lane.b32.xlu0 %v5889_v59, %s5637_s15 }
 0xbae   :  { %1864 = vrot.lane.b32.xlu0 %v1439_v52, %s5639_s18 }
 0xc1d   :  { %v1692_v13 = vpop.xlane.xlu0 %1691 }
 0xc1e   :  { %5512 = vrcp.f32 %v1692_v13 }
 0xc21   :  { %v1695_v14 = vpop.xlane.xlu0 %1694 }
 0xc22   :  { %5514 = vrcp.f32 %v1695_v14 }
 0xc25   :  { %v1701_v15 = vpop.permute.xlu0 %1700 }
 0xc26   :  { %5117 = vmatpush3.msk.msra.mxu1 %vm702_vm6, %v1701_v15 }
 0xc27   :  { %5355 = vmatprep.subr.bf16.mxu1 %v5354_v24 }
 0xc28   :  { %v5513_v16 = vpop.eup %5512 }
 0xc29   :  { %v1698_v17 = vmul.f32 %v5513_v16, %v5509_v63  ;;  %v1865_v34 = vpop.permute.xlu0 %1864 }
 0xc2a   :  { %v1881_v39 = vsel %vm1880_vm9, %v1878_v35, %v1865_v34  ;;  %v2168_v35 = vld [vmem:[%s5700_s19] sm:$0xff] }
 0xc2b   :  { %5119 = vmatmul.mubr.msk.f32.vlgmr.msra.gmra.mrb[26].mxu1 %vm698_vm7, %v1698_v17  ;;  %v4848_v17 = vld [vmem:[%s5685_s3] ss:$0 sm:$0xff]  ;;  %s6435_s3 = sld [smem:[#allocation5_spill]] }
 0xc2c   :  { %v5515_v18 = vpop.eup %5514  ;;  %5357 = vmatpush3.bf16.msra.mxu1 %v5354_v24 }
 0xc2d   :  { %v1699_v19 = vmul.f32 %v5515_v18, %v5511_v11  ;;  %5359 = vmatprep.subr.bf16.mxu1 %v5358_v31 }
 0xc2f   :  { %5124 = vmatmul.mubr.msk.f32.vlgmr.msra.gmra.mrb[8].mxu0 %vm698_vm7, %v1699_v19 }
 0xc30   :  { %5361 = vmatpush3.bf16.msra.mxu1 %v5358_v31 }
 0xcfe   :  { %v1773_v59 = vpop.f32.mrb[26].mxu1 }
 0xcff   :  { %1872 = vrot.lane.b32.xlu0 %v1773_v59, %s5640_s22  ;;  %v5120_v23 = vpop.f32.mrb[27].mxu1 }
 0xd02   :  { %v1850_v27 = vpop.f32.mrb[8].mxu0 }
 0xd03   :  { %1874 = vrot.lane.b32.xlu1 %v1850_v27, %s5640_s22  ;;  %v5125_v30 = vpop.f32.mrb[9].mxu0 }
 0xd71   :  { %v1873_v40 = vpop.permute.xlu0 %1872 }
 0xd72   :  { %v1884_v41 = vsel %vm1883_vm8, %v1881_v39, %v1873_v40  ;;  %v5362_v39 = vpack.c.bf16 %v2169_v37, %v2168_v35  ;;  %v2170_v40 = vld [vmem:[%s5700_s19 + $0x10] sm:$0xff] }
 0xd73   :  { %v1888_v42 = vcombine.high %v1884_v41, %v1884_v41  ;;  %v1895_v44 = vrot.slane %v1884_v41, %v5866_v26  ;;  %v2171_v41 = vld [vmem:[%s5700_s19 + $0x18] sm:$0xff]  ;;  %s6438_s19 = sld [smem:[#allocation9_spill]] }
 0xd74   :  { %5363 = vmatprep.subr.bf16.mxu0 %v5362_v39 }
 0xd75   :  { %v1903_v47 = vcombine.high %v1895_v44, %v1895_v44  ;;  %v1875_v49 = vpop.permute.xlu1 %1874  ;;  %v1902_v50 = vrot.slane %v1888_v42, %v5866_v26  ;;  %v1910_v51 = vrot.slane %v1895_v44, %v5866_v26  ;;  %5365 = vmatpush3.bf16.msra.mxu0 %v5362_v39  ;;  %v5366_v42 = vpack.c.bf16 %v2171_v41, %v2170_v40 }
 0xd76   :  { %v1885_v36 = vsel %vm1883_vm8, %v1882_v46, %v1875_v49 }
 0xd77   :  { %v1924_v52 = vrot.slane %v1903_v47, %v5866_v26  ;;  %v1927_v53 = vcombine.high %v1885_v36, %v1885_v36  ;;  %v1934_v54 = vrot.slane %v1885_v36, %v5866_v26  ;;  %v1917_v58 = vrot.slane %v1902_v50, %v5866_v26  ;;  %5367 = vmatprep.subr.bf16.mxu0 %v5366_v42 }
 0xd79   :  { %v1970_v55 = vcombine.low %v1910_v51, %v1924_v52  ;;  %v4845_v56 = vcombine.high %v1910_v51, %v1924_v52  ;;  %v1941_v57 = vrot.slane %v1927_v53, %v5866_v26  ;;  %v1942_v38 = vcombine.high %v1934_v54, %v1934_v54  ;;  %5369 = vmatpush3.bf16.msra.mxu0 %v5366_v42  ;;  %v4849_v51 = vld [vmem:[%s5690_s8] ss:$0 sm:$0xff]  ;;  %s6436_s8 = sld [smem:[#allocation6_spill]] }
 0xd7a   :  { %v1949_v60 = vrot.slane %v1934_v54, %v5866_v26  ;;  %v4850_v53 = vld [vmem:[%s5695_s14] ss:$0 sm:$0xff]  ;;  %s6437_s14 = sld [smem:[#allocation8_spill]] }
 0xd7b   :  { %v1963_v61 = vrot.slane %v1942_v38, %v5866_v26  ;;  %v1980_v62 = vrot.slane %v1970_v55, %v5866_v26  ;;  %v1987_v0 = vrot.slane %v4845_v56, %v5866_v26  ;;  %v1956_v4 = vrot.slane %v1941_v57, %v5866_v26 }
 0xd7c   :  { %v1964_v1 = vcombine.high %v1949_v60, %v1949_v60  ;;  %v1972_v2 = vcombine.low %v1917_v58, %v1949_v60  ;;  %v2270_v60 = vld [vmem:[%s5710_s30] sm:$0xff] }
 0xd7d   :  { %v1965_v5 = vcombine.high %v1963_v61, %v1963_v61  ;;  %v2002_v8 = vcombine.low %v1980_v62, %v1987_v0  ;;  %v2272_v0 = vld [vmem:[%s5710_s30 + $0x10] sm:$0xff] }
 0xd7e   :  { %v1973_v6 = vcombine.low %v1963_v61, %v1964_v1  ;;  %v1994_v9 = vrot.slane %v1972_v2, %v5866_v26  ;;  %v2271_v61 = vld [vmem:[%s5710_s30 + $0x8] sm:$0xff]  ;;  %v2273_v1 = vld [vmem:[%s5710_s30 + $0x18] sm:$0xff] }
 0xd7f   :  { %v2019_v7 = vcombine.low %v1965_v5, %v1956_v4  ;;  %v2010_v12 = vrot.slane %v2002_v8, %v5866_v26  ;;  %v5370_v62 = vpack.c.bf16 %v2271_v61, %v2270_v60  ;;  %v5374_v2 = vpack.c.bf16 %v2273_v1, %v2272_v0  ;;  %v2274_v4 = vld [vmem:[%s5710_s30 + $0x20] sm:$0xff]  ;;  %v2275_v5 = vld [vmem:[%s5710_s30 + $0x28] sm:$0xff]  ;;  %v2277_v8 = vld [vmem:[%s5710_s30 + $0x38] sm:$0xff] }
 0xd80   :  { %v2001_v63 = vrot.slane %v1973_v6, %v5866_v26  ;;  %v5378_v6 = vpack.c.bf16 %v2275_v5, %v2274_v4  ;;  %v4858_v0 = vld [vmem:[%s6436_s8] ss:$0 sm:$0xff] }
 0xd81   :  { %v2026_v11 = vrot.slane %v2019_v7, %v5866_v26  ;;  %5371 = vmatprep.subr.bf16.mxu1 %v5370_v62  ;;  %v2276_v7 = vld [vmem:[%s5710_s30 + $0x30] sm:$0xff]  ;;  %s6440_s30 = sld [smem:[#allocation10_spill]] }
 0xd82   :  { %v2003_v10 = vcombine.low %v1994_v9, %v2001_v63  ;;  %v5382_v9 = vpack.c.bf16 %v2277_v8, %v2276_v7  ;;  %v4851_v63 = vld [vmem:[%s5705_s24] ss:$0 sm:$0xff]  ;;  %s6439_s24 = sld [smem:[#allocation12_spill]] }
 0xd83   :  { %v2033_v15 = vrot.slane %v2026_v11, %v5866_v26 }
 0xd84   :  { %v2017_v13 = vrot.slane %v2003_v10, %v5866_v26 }
 0xd86   :  { %v2018_v14 = vcombine.low %v2010_v12, %v2017_v13 }
 0xd88   :  { %5134 = vmatprep.mubr.msk.f32.mxu1 %vm237_vm1, %v2018_v14 }
 0xd89   :  { %5135 = vmatmul.mubr.msk.f32.vlgmr.msra.gmra.mrb[28].mxu1 %vm237_vm1, %v2033_v15 }
 0xd8a   :  { %5373 = vmatpush3.bf16.msra.mxu1 %v5370_v62 }
 0xd8b   :  { %5375 = vmatprep.subr.bf16.mxu1 %v5374_v2 }
 0xd8e   :  { %5377 = vmatpush3.bf16.msra.mxu1 %v5374_v2 }
 0xd8f   :  { %5379 = vmatprep.subr.bf16.mxu1 %v5378_v6 }
 0xd92   :  { %5381 = vmatpush3.bf16.msra.mxu1 %v5378_v6 }
 0xd93   :  { %5383 = vmatprep.subr.bf16.mxu1 %v5382_v9 }
 0xd96   :  { %5385 = vmatpush3.bf16.msra.mxu1 %v5382_v9 }
 0xd97   :  { %5188 = vmatprep.subr.mxu1 %v5624_v20 }
 0xe5c   :  { %v5136_v16 = vpop.f32.mrb[28].mxu1 }
 0xe5d   :  { %v2114_v18 = vadd.f32 %v5136_v16, %v5845_v48  ;;  %v2104_v19 = vpop.f32.mrb[29].mxu1 }
 0xe5e   :  { %v2113_v59 = vadd.f32 %v2104_v19, %v5840_v43 }
 0xe5f   :  { %v6082_v21 = vadd.f32 %v4848_v17, %v2114_v18 }
 0xe60   :  { %v6084_v22 = vadd.f32 %v4848_v17, %v2113_v59 }
 0xe61   :  { %v2129_v23 = vsel %vm241_vm2, %v6082_v21, 0.0 }
 0xe62   :  { %2130 = vadd.xlane.f32.xlu1 %v2129_v23  ;;  %v2126_v24 = vsel %vm237_vm1, %v6084_v22, 0.0 }
 0xe63   :  { %2127 = vadd.xlane.f32.xlu0 %v2126_v24 }
 0xeef   :  { %v2131_v27 = vpop.xlane.xlu1 %2130 }
 0xef0   :  { %v2133_v28 = vmul.f32 0.03125, %v2131_v27  ;;  %v2128_v48 = vpop.xlane.xlu0 %2127 }
 0xef1   :  { %v2132_v43 = vmul.f32 0.03125, %v2128_v48  ;;  %v4856_v48 = vld [vmem:[%s5715_s6] ss:$0 sm:$0xff]  ;;  %s6441_s6 = sld [smem:[#allocation11_spill]] }
 0xef2   :  { %v2135_v29 = vsub.f32 %v6082_v21, %v2133_v28 }
 0xef3   :  { %v2134_v30 = vsub.f32 %v6084_v22, %v2132_v43 }
 0xef4   :  { %v2137_v33 = vmul.f32 %v2135_v29, %v2135_v29 }
 0xef5   :  { %v2136_v31 = vmul.f32 %v2134_v30, %v2134_v30 }
 0xef6   :  { %v2141_v34 = vsel %vm241_vm2, %v2137_v33, 0.0 }
 0xef7   :  { %v2138_v32 = vsel %vm237_vm1, %v2136_v31, 0.0 }
 0xef8   :  { %2139 = vadd.xlane.f32.xlu0 %v2138_v32 }
 0xefc   :  { %2142 = vadd.xlane.f32.xlu0 %v2141_v34 }
 0xf85   :  { %v2140_v44 = vpop.xlane.xlu0 %2139 }
 0xf86   :  { %v2144_v45 = vmul.f32 0.03125, %v2140_v44 }
 0xf88   :  { %v2146_v46 = vadd.f32 1e-05, %v2144_v45 }
 0xf89   :  { %v2143_v47 = vpop.xlane.xlu0 %2142 }
 0xf8a   :  { %5516 = vrsqrt.f32 %v2146_v46  ;;  %v2145_v49 = vmul.f32 0.03125, %v2143_v47  ;;  %v2414_v46 = vld [vmem:[%s6434_s29] sm:$0xff]  ;;  %v2415_v47 = vld [vmem:[%s6434_s29 + $0x8] sm:$0xff] }
 0xf8c   :  { %v2147_v50 = vadd.f32 1e-05, %v2145_v49  ;;  %v5386_v49 = vpack.c.bf16 %v2415_v47, %v2414_v46 }
 0xf8e   :  { %5518 = vrsqrt.f32 %v2147_v50  ;;  %5387 = vmatprep.subr.bf16.mxu0 %v5386_v49  ;;  %v2416_v50 = vld [vmem:[%s6434_s29 + $0x10] sm:$0xff] }
 0xf94   :  { %v5517_v36 = vpop.eup %5516 }
 0xf95   :  { %v2150_v52 = vmul.f32 %v5517_v36, %v2134_v30  ;;  %v2417_v36 = vld [vmem:[%s6434_s29 + $0x18] sm:$0xff] }
 0xf97   :  { %v2158_v54 = vmul.f32 %v4849_v51, %v2150_v52 }
 0xf98   :  { %v5519_v55 = vpop.eup %5518 }
 0xf99   :  { %v2151_v56 = vmul.f32 %v5519_v55, %v2135_v29  ;;  %v2166_v57 = vadd.f32 %v4850_v53, %v2158_v54 }
 0xf9b   :  { %v2159_v38 = vmul.f32 %v4849_v51, %v2151_v56  ;;  %5145 = vmatprep.mubr.msk.f32.mxu0 %vm237_vm1, %v2166_v57  ;;  %v5390_v51 = vpack.c.bf16 %v2417_v36, %v2416_v50 }
 0xf9d   :  { %v2167_v58 = vadd.f32 %v4850_v53, %v2159_v38 }
 0xf9f   :  { %5146 = vmatmul.mubr.msk.f32.vlgmr.msra.gmra.mrb[10].mxu0 %vm237_vm1, %v2167_v58  ;;  %v4857_v58 = vld [vmem:[%s6435_s3] ss:$0 sm:$0xff] }
 0xfa0   :  { %5389 = vmatpush3.bf16.msra.mxu0 %v5386_v49 }
 0xfa1   :  { %5391 = vmatprep.subr.bf16.mxu0 %v5390_v51 }
 0xfa4   :  { %5393 = vmatpush3.bf16.msra.mxu0 %v5390_v51 }
 0xfa5   :  { %5178 = vmatprep.subr.mxu0 %v5624_v20 }
0x1072   :  { %v5147_v10 = vpop.f32.mrb[10].mxu0 }
0x1073   :  { %v2257_v11 = vadd.f32 %v5147_v10, %v4851_v63  ;;  %v2251_v12 = vpop.f32.mrb[11].mxu0 }
0x1074   :  { %v2252_v13 = vadd.f32 %v4851_v63, %v2251_v12 }
0x1075   :  { %v2263_v14 = vmul.f32 0.70710677, %v2257_v11  ;;  %v2261_v23 = vmul.f32 0.5, %v2257_v11 }
0x1076   :  { %v2262_v15 = vmul.f32 0.70710677, %v2252_v13  ;;  %v2260_v19 = vmul.f32 0.5, %v2252_v13 }
0x1077   :  { %5520 = verf.f32 %v2263_v14 }
0x1078   :  { %5522 = verf.f32 %v2262_v15 }
0x1081   :  { %v5521_v16 = vpop.eup %5520 }
0x1082   :  { %v5523_v17 = vpop.eup %5522  ;;  %v2267_v18 = vadd.f32 1.0, %v5521_v16 }
0x1083   :  { %v2266_v59 = vadd.f32 1.0, %v5523_v17 }
0x1084   :  { %v2269_v27 = vmul.f32 %v2267_v18, %v2261_v23 }
0x1085   :  { %v2268_v24 = vmul.f32 %v2266_v59, %v2260_v19 }
0x1087   :  { %5164 = vmatprep.mubr.msk.f32.mxu1 %vm153_vm0, %v2268_v24 }
0x1088   :  { %5165 = vmatmul.mubr.msk.f32.vlgmr.msra.gmra.mrb[30].mxu1 %vm153_vm0, %v2269_v27 }
0x1089   :  { %5190 = vmatprep.mubr.msk.f32.mxu1 %vm5626_vm3, %v5624_v20 }
0x115b   :  { %v5166_v28 = vpop.f32.mrb[30].mxu1 }
0x115c   :  { %v2360_v43 = vadd.f32 %v5166_v28, %v6082_v21  ;;  %v2350_v29 = vpop.f32.mrb[31].mxu1 }
0x115d   :  { %v2359_v30 = vadd.f32 %v2350_v29, %v6084_v22 }
0x115e   :  { %v6119_v31 = vadd.f32 %v4856_v48, %v2360_v43 }
0x115f   :  { %v6121_v32 = vadd.f32 %v4856_v48, %v2359_v30 }
0x1160   :  { %v2375_v33 = vsel %vm241_vm2, %v6119_v31, 0.0 }
0x1161   :  { %2376 = vadd.xlane.f32.xlu1 %v2375_v33  ;;  %v2372_v34 = vsel %vm237_vm1, %v6121_v32, 0.0 }
0x1162   :  { %2373 = vadd.xlane.f32.xlu0 %v2372_v34 }
0x11ee   :  { %v2377_v35 = vpop.xlane.xlu1 %2376 }
0x11ef   :  { %v2379_v21 = vmul.f32 0.03125, %v2377_v35  ;;  %v2374_v37 = vpop.xlane.xlu0 %2373 }
0x11f0   :  { %v2378_v22 = vmul.f32 0.03125, %v2374_v37 }
0x11f1   :  { %v2381_v39 = vsub.f32 %v6119_v31, %v2379_v21 }
0x11f2   :  { %v2380_v40 = vsub.f32 %v6121_v32, %v2378_v22 }
0x11f3   :  { %v2383_v41 = vmul.f32 %v2381_v39, %v2381_v39 }
0x11f4   :  { %v2382_v42 = vmul.f32 %v2380_v40, %v2380_v40 }
0x11f5   :  { %v2387_v44 = vsel %vm241_vm2, %v2383_v41, 0.0 }
0x11f6   :  { %2388 = vadd.xlane.f32.xlu1 %v2387_v44  ;;  %v2384_v45 = vsel %vm237_vm1, %v2382_v42, 0.0 }
0x11f7   :  { %2385 = vadd.xlane.f32.xlu0 %v2384_v45 }
0x1283   :  { %v2389_v52 = vpop.xlane.xlu1 %2388 }
0x1284   :  { %v2391_v53 = vmul.f32 0.03125, %v2389_v52  ;;  %v2386_v54 = vpop.xlane.xlu0 %2385 }
0x1285   :  { %v2390_v55 = vmul.f32 0.03125, %v2386_v54 }
0x1286   :  { %v2393_v56 = vadd.f32 1e-05, %v2391_v53 }
0x1287   :  { %v2392_v57 = vadd.f32 1e-05, %v2390_v55 }
0x1288   :  { %5524 = vrsqrt.f32 %v2393_v56 }
0x1289   :  { %5526 = vrsqrt.f32 %v2392_v57 }
0x1292   :  { %v5525_v38 = vpop.eup %5524 }
0x1293   :  { %v5527_v60 = vpop.eup %5526  ;;  %v2397_v61 = vmul.f32 %v5525_v38, %v2381_v39 }
0x1294   :  { %v2396_v62 = vmul.f32 %v5527_v60, %v2380_v40 }
0x1295   :  { %v2405_v1 = vmul.f32 %v4857_v58, %v2397_v61 }
0x1296   :  { %v2404_v2 = vmul.f32 %v4857_v58, %v2396_v62 }
0x1297   :  { %v2413_v5 = vadd.f32 %v4858_v0, %v2405_v1 }
0x1298   :  { %v2412_v4 = vadd.f32 %v4858_v0, %v2404_v2 }
0x129a   :  { %5175 = vmatprep.mubr.msk.f32.mxu0 %vm237_vm1, %v2412_v4 }
0x129b   :  { %5176 = vmatmul.mubr.msk.f32.vlgmr.msra.gmra.mrb[12].mxu0 %vm237_vm1, %v2413_v5 }
0x129c   :  { %5180 = vmatprep.mubr.msk.f32.mxu0 %vm5626_vm3, %v5624_v20 }
0x136e   :  { %v5177_v6 = vpop.f32.mrb[12].mxu0 }
0x136f   :  { %v2556_v7 = vrot.slane %v5177_v6, %v5866_v26  ;;  %v2490_v8 = vpop.f32.mrb[13].mxu0 }
0x1370   :  { %v2501_v9 = vcombine.high %v2490_v8, %v2490_v8  ;;  %v2508_v63 = vrot.slane %v2490_v8, %v5866_v26 }
0x1371   :  { %v2557_v12 = vcombine.high %v2556_v7, %v2556_v7  ;;  %v2564_v23 = vrot.slane %v2556_v7, %v5866_v26 }
0x1372   :  { %v2515_v10 = vrot.slane %v2501_v9, %v5866_v26  ;;  %v2516_v11 = vcombine.high %v2508_v63, %v2508_v63  ;;  %v2524_v14 = vrot.slane %v2508_v63, %v5866_v26 }
0x1373   :  { %v2571_v24 = vrot.slane %v2557_v12, %v5866_v26 }
0x1374   :  { %v2517_v13 = vcombine.high %v2515_v10, %v2515_v10  ;;  %v2531_v15 = vrot.slane %v2515_v10, %v5866_v26  ;;  %v2538_v16 = vrot.slane %v2516_v11, %v5866_v26 }
0x1375   :  { %v2709_v34 = vrot.slane %v2571_v24, %v5866_v26 }
0x1376   :  { %v2545_v17 = vrot.slane %v2517_v13, %v5866_v26  ;;  %v2547_v18 = vcombine.high %v2531_v15, %v2531_v15  ;;  %v2572_v19 = vcombine.low %v2524_v14, %v2538_v16  ;;  %v4861_v59 = vcombine.high %v2524_v14, %v2538_v16 }
0x1377   :  { %v2594_v27 = vrot.slane %v2531_v15, %v5866_v26  ;;  %v2724_v41 = vrot.slane %v2709_v34, %v5866_v26 }
0x1378   :  { %v2549_v28 = vcombine.high %v2545_v17, %v2545_v17  ;;  %v2580_v48 = vrot.slane %v2572_v19, %v5866_v26  ;;  %v2587_v43 = vrot.slane %v4861_v59, %v5866_v26  ;;  %v2687_v29 = vcombine.low %v2545_v17, %v2547_v18 }
0x1379   :  { %v2609_v21 = vrot.slane %v2594_v27, %v5866_v26 }
0x137a   :  { %v2595_v30 = vcombine.low %v2580_v48, %v2587_v43  ;;  %v2688_v33 = vcombine.low %v2549_v28, %v2564_v23  ;;  %v2695_v37 = vrot.slane %v2687_v29, %v5866_v26 }
0x137c   :  { %v2602_v35 = vrot.slane %v2595_v30, %v5866_v26  ;;  %v2702_v22 = vrot.slane %v2688_v33, %v5866_v26 }
0x137e   :  { %v6159_v39 = vcombine.low %v2602_v35, %v2609_v21  ;;  %v2710_v40 = vcombine.low %v2695_v37, %v2702_v22 }
0x1380   :  { %v2717_v42 = vrot.slane %v2710_v40, %v5866_v26  ;;  %2611 = vrot.lane.b32.xlu0 %v6159_v39, %s5627_s0 }
0x1382   :  { %v6165_v44 = vcombine.low %v2717_v42, %v2724_v41 }
0x1384   :  { %2726 = vrot.lane.b32.xlu1 %v6165_v44, %s5627_s0 }
0x13f2   :  { %v2612_v45 = vpop.permute.xlu0 %2611 }
0x13f3   :  { %5179 = vmatpush3.xpose.msk.msra.mxu0 %vm481_vm4, %v2612_v45 }
0x13f4   :  { %5183 = vmatprep.subr.mxu0 %v5624_v20 }
0x13f6   :  { %5181 = vmatmul.mubr.msk.f32.vlgmr.msra.gmra.mrb[14].mxu0 %vm481_vm4, %v6159_v39  ;;  %v2727_v46 = vpop.permute.xlu1 %2726 }
0x13f7   :  { %5184 = vmatpush3.xpose.msk.msra.mxu0 %vm481_vm4, %v2727_v46  ;;  %5185 = vmatprep.mubr.msk.f32.mxu0 %vm5626_vm3, %v5624_v20 }
0x13f8   :  { %5193 = vmatprep.subr.mxu0 %v5624_v20 }
0x13fa   :  { %5186 = vmatmul.mubr.msk.f32.vlgmr.msra.gmra.mrb[16].mxu0 %vm481_vm4, %v6165_v44 }
0x13fb   :  { %5195 = vmatprep.mubr.msk.f32.mxu0 %vm5626_vm3, %v5624_v20 }
0x14c9   :  { %v2683_v47 = vpop.f32.mrb[14].mxu0 }
0x14ca   :  { %v2802_v49 = vmul.f32 0.35355338, %v2683_v47  ;;  %v5182_v50 = vpop.f32.mrb[15].mxu0 }
0x14cc   :  { %v2804_v36 = vsel %vm673_vm5, %v2802_v49, -inf }
0x14cd   :  { %2805 = vmax.xlane.f32.xlu1 %v2804_v36  ;;  %v2798_v51 = vpop.f32.mrb[16].mxu0 }
0x14ce   :  { %v2803_v52 = vmul.f32 0.35355338, %v2798_v51  ;;  %v5187_v53 = vpop.f32.mrb[17].mxu0 }
0x14d0   :  { %v2807_v54 = vsel %vm673_vm5, %v2803_v52, -inf }
0x14d1   :  { %2808 = vmax.xlane.f32.xlu0 %v2807_v54 }
0x14de   :  { %2903 = vrot.lane.b32.xlu1 %v6165_v44, %s5628_s5 }
0x14e2   :  { %2982 = vrot.lane.b32.xlu1 %v6159_v39, %s5629_s9 }
0x14e6   :  { %3060 = vrot.lane.b32.xlu1 %v6165_v44, %s5629_s9 }
0x14e7   :  { %2826 = vrot.lane.b32.xlu0 %v6159_v39, %s5628_s5 }
0x155a   :  { %v2806_v55 = vpop.xlane.xlu1 %2805 }
0x155b   :  { %v2810_v56 = vsub.f32 %v2802_v49, %v2806_v55 }
0x155d   :  { %v2812_v57 = vmul.f32 1.442695, %v2810_v56 }
0x155e   :  { %v2809_v38 = vpop.xlane.xlu0 %2808  ;;  %v2904_v58 = vpop.permute.xlu1 %2903 }
0x155f   :  { %5528 = vpow2.f32 %v2812_v57  ;;  %v2811_v60 = vsub.f32 %v2803_v52, %v2809_v38  ;;  %5194 = vmatpush3.msk.msra.mxu0 %vm702_vm6, %v2904_v58 }
0x1560   :  { %5203 = vmatprep.subr.mxu0 %v5624_v20 }
0x1561   :  { %v2814_v61 = vmul.f32 1.442695, %v2811_v60 }
0x1562   :  { %v2827_v62 = vpop.permute.xlu0 %2826  ;;  %v2983_v5 = vpop.permute.xlu1 %2982 }
0x1563   :  { %5530 = vpow2.f32 %v2814_v61  ;;  %5189 = vmatpush3.msk.msra.mxu1 %vm702_vm6, %v2827_v62 }
0x1564   :  { %5198 = vmatprep.subr.mxu1 %v5624_v20 }
0x1566   :  { %v3061_v6 = vpop.permute.xlu1 %3060 }
0x1569   :  { %v5529_v0 = vpop.eup %5528 }
0x156a   :  { %v2816_v1 = vsel %vm673_vm5, %v5529_v0, 0.0 }
0x156b   :  { %2817 = vadd.xlane.f32.xlu0 %v2816_v1 }
0x156d   :  { %v5531_v2 = vpop.eup %5530 }
0x156e   :  { %v2819_v4 = vsel %vm673_vm5, %v5531_v2, 0.0 }
0x156f   :  { %2820 = vadd.xlane.f32.xlu1 %v2819_v4 }
0x1580   :  { %3058 = vrot.lane.b32.xlu1 %v6165_v44, %s5630_s13 }
0x1581   :  { %2980 = vrot.lane.b32.xlu0 %v6159_v39, %s5630_s13 }
0x15f8   :  { %v2818_v7 = vpop.xlane.xlu0 %2817 }
0x15f9   :  { %5532 = vrcp.f32 %v2818_v7 }
0x15fc   :  { %v2821_v8 = vpop.xlane.xlu1 %2820  ;;  %v2981_v12 = vpop.permute.xlu0 %2980 }
0x15fd   :  { %5534 = vrcp.f32 %v2821_v8 }
0x1600   :  { %v3059_v13 = vpop.permute.xlu1 %3058 }
0x1603   :  { %v5533_v9 = vpop.eup %5532 }
0x1604   :  { %v2824_v63 = vmul.f32 %v5533_v9, %v5529_v0 }
0x1606   :  { %5191 = vmatmul.mubr.msk.f32.vlgmr.msra.gmra.mrb[32].mxu1 %vm698_vm7, %v2824_v63 }
0x1607   :  { %v5535_v10 = vpop.eup %5534  ;;  %5199 = vmatpush3.xpose.msk.msra.mxu1 %vm481_vm4, %v2983_v5  ;;  %5200 = vmatprep.mubr.msk.f32.mxu1 %vm5626_vm3, %v5624_v20 }
0x1608   :  { %v2825_v11 = vmul.f32 %v5535_v10, %v5531_v2  ;;  %5208 = vmatprep.subr.mxu1 %v5624_v20 }
0x160a   :  { %5196 = vmatmul.mubr.msk.f32.vlgmr.msra.gmra.mrb[18].mxu0 %vm698_vm7, %v2825_v11  ;;  %5201 = vmatmul.mubr.msk.f32.vlgmr.msra.gmra.mrb[34].mxu1 %vm481_vm4, %v2981_v12 }
0x160b   :  { %5204 = vmatpush3.xpose.msk.msra.mxu0 %vm481_vm4, %v3061_v6  ;;  %5205 = vmatprep.mubr.msk.f32.mxu0 %vm5626_vm3, %v5624_v20 }
0x160c   :  { %5213 = vmatprep.subr.mxu0 %v5624_v20  ;;  %5210 = vmatprep.mubr.msk.f32.mxu1 %vm5626_vm3, %v5624_v20 }
0x160e   :  { %5206 = vmatmul.mubr.msk.f32.vlgmr.msra.gmra.mrb[20].mxu0 %vm481_vm4, %v3059_v13 }
0x160f   :  { %5215 = vmatprep.mubr.msk.f32.mxu0 %vm5626_vm3, %v5624_v20 }
0x16d9   :  { %v6217_v14 = vpop.f32.mrb[32].mxu1 }
0x16da   :  { %v5192_v15 = vpop.f32.mrb[33].mxu1 }
0x16dd   :  { %v6219_v16 = vpop.f32.mrb[18].mxu0  ;;  %v3054_v17 = vpop.f32.mrb[34].mxu1 }
0x16de   :  { %v3136_v18 = vmul.f32 0.35355338, %v3054_v17  ;;  %v5197_v19 = vpop.f32.mrb[19].mxu0  ;;  %v5202_v59 = vpop.f32.mrb[35].mxu1 }
0x16e0   :  { %v3138_v23 = vsel %vm673_vm5, %v3136_v18, -inf }
0x16e1   :  { %3139 = vmax.xlane.f32.xlu0 %v3138_v23  ;;  %v3132_v24 = vpop.f32.mrb[20].mxu0 }
0x16e2   :  { %v3137_v27 = vmul.f32 0.35355338, %v3132_v24  ;;  %v5207_v28 = vpop.f32.mrb[21].mxu0 }
0x16e4   :  { %v3141_v48 = vsel %vm673_vm5, %v3137_v27, -inf }
0x16e5   :  { %3142 = vmax.xlane.f32.xlu1 %v3141_v48 }
0x16f6   :  { %3237 = vrot.lane.b32.xlu1 %v6165_v44, %s5631_s17 }
0x16f7   :  { %3160 = vrot.lane.b32.xlu0 %v6159_v39, %s5631_s17 }
0x16fa   :  { %3316 = vrot.lane.b32.xlu1 %v6159_v39, %s5632_s21 }
0x16fe   :  { %3394 = vrot.lane.b32.xlu1 %v6165_v44, %s5632_s21 }
0x1702   :  { %3392 = vrot.lane.b32.xlu1 %v6165_v44, %s5633_s25 }
0x176e   :  { %v3140_v43 = vpop.xlane.xlu0 %3139 }
0x176f   :  { %v3144_v29 = vsub.f32 %v3136_v18, %v3140_v43 }
0x1771   :  { %v3146_v30 = vmul.f32 1.442695, %v3144_v29 }
0x1772   :  { %v3161_v33 = vpop.permute.xlu0 %3160  ;;  %v3143_v34 = vpop.xlane.xlu1 %3142 }
0x1773   :  { %5536 = vpow2.f32 %v3146_v30  ;;  %v3145_v35 = vsub.f32 %v3137_v27, %v3143_v34  ;;  %5209 = vmatpush3.msk.msra.mxu1 %vm702_vm6, %v3161_v33 }
0x1774   :  { %5218 = vmatprep.subr.mxu1 %v5624_v20 }
0x1775   :  { %v3148_v21 = vmul.f32 1.442695, %v3145_v35 }
0x1776   :  { %v3238_v37 = vpop.permute.xlu1 %3237 }
0x1777   :  { %5538 = vpow2.f32 %v3148_v21  ;;  %5214 = vmatpush3.msk.msra.mxu0 %vm702_vm6, %v3238_v37 }
0x1778   :  { %5223 = vmatprep.subr.mxu0 %v5624_v20 }
0x177a   :  { %v3317_v47 = vpop.permute.xlu1 %3316 }
0x177d   :  { %v5537_v22 = vpop.eup %5536 }
0x177e   :  { %v3150_v40 = vsel %vm673_vm5, %v5537_v22, 0.0  ;;  %v3395_v51 = vpop.permute.xlu1 %3394 }
0x177f   :  { %3151 = vadd.xlane.f32.xlu0 %v3150_v40 }
0x1781   :  { %v5539_v41 = vpop.eup %5538 }
0x1782   :  { %v3153_v42 = vsel %vm673_vm5, %v5539_v41, 0.0  ;;  %v3393_v54 = vpop.permute.xlu1 %3392 }
0x1783   :  { %3154 = vadd.xlane.f32.xlu0 %v3153_v42 }
0x1799   :  { %3314 = vrot.lane.b32.xlu0 %v6159_v39, %s5633_s25 }
0x180c   :  { %v3152_v45 = vpop.xlane.xlu0 %3151 }
0x180d   :  { %5540 = vrcp.f32 %v3152_v45 }
0x1810   :  { %v3155_v46 = vpop.xlane.xlu0 %3154 }
0x1811   :  { %5542 = vrcp.f32 %v3155_v46 }
0x1814   :  { %v3315_v53 = vpop.permute.xlu0 %3314 }
0x1817   :  { %v5541_v49 = vpop.eup %5540 }
0x1818   :  { %v3158_v50 = vmul.f32 %v5541_v49, %v5537_v22 }
0x181a   :  { %5211 = vmatmul.mubr.msk.f32.vlgmr.msra.gmra.mrb[36].mxu1 %vm698_vm7, %v3158_v50 }
0x181b   :  { %v5543_v36 = vpop.eup %5542  ;;  %5219 = vmatpush3.xpose.msk.msra.mxu1 %vm481_vm4, %v3317_v47  ;;  %5220 = vmatprep.mubr.msk.f32.mxu1 %vm5626_vm3, %v5624_v20 }
0x181c   :  { %v3159_v52 = vmul.f32 %v5543_v36, %v5539_v41  ;;  %5228 = vmatprep.subr.mxu1 %v5624_v20 }
0x181e   :  { %5216 = vmatmul.mubr.msk.f32.vlgmr.msra.gmra.mrb[22].mxu0 %vm698_vm7, %v3159_v52  ;;  %5221 = vmatmul.mubr.msk.f32.vlgmr.msra.gmra.mrb[38].mxu1 %vm481_vm4, %v3315_v53 }
0x181f   :  { %5224 = vmatpush3.xpose.msk.msra.mxu0 %vm481_vm4, %v3395_v51  ;;  %5225 = vmatprep.mubr.msk.f32.mxu0 %vm5626_vm3, %v5624_v20 }
0x1820   :  { %5233 = vmatprep.subr.mxu0 %v5624_v20  ;;  %5230 = vmatprep.mubr.msk.f32.mxu1 %vm5626_vm3, %v5624_v20 }
0x1822   :  { %5226 = vmatmul.mubr.msk.f32.vlgmr.msra.gmra.mrb[24].mxu0 %vm481_vm4, %v3393_v54 }
0x1823   :  { %5235 = vmatprep.mubr.msk.f32.mxu0 %vm5626_vm3, %v5624_v20 }
0x18ed   :  { %v6257_v55 = vpop.f32.mrb[36].mxu1 }
0x18ee   :  { %v5212_v56 = vpop.f32.mrb[37].mxu1 }
0x18f1   :  { %v6259_v57 = vpop.f32.mrb[22].mxu0  ;;  %v3388_v38 = vpop.f32.mrb[38].mxu1 }
0x18f2   :  { %v3470_v58 = vmul.f32 0.35355338, %v3388_v38  ;;  %v5217_v60 = vpop.f32.mrb[23].mxu0  ;;  %v5222_v61 = vpop.f32.mrb[39].mxu1 }
0x18f4   :  { %v3472_v62 = vsel %vm673_vm5, %v3470_v58, -inf }
0x18f5   :  { %3473 = vmax.xlane.f32.xlu0 %v3472_v62  ;;  %v3466_v0 = vpop.f32.mrb[24].mxu0 }
0x18f6   :  { %v3471_v1 = vmul.f32 0.35355338, %v3466_v0  ;;  %v5227_v2 = vpop.f32.mrb[25].mxu0 }
0x18f7   :  { %v4093_v2 = vld [vmem:[%s6437_s14 + $0x8] sm:$0xff] }
0x18f8   :  { %v3475_v4 = vsel %vm673_vm5, %v3471_v1, -inf }
0x18f9   :  { %3476 = vmax.xlane.f32.xlu1 %v3475_v4 }
0x190a   :  { %3571 = vrot.lane.b32.xlu1 %v6165_v44, %s5634_s7 }
0x190b   :  { %3494 = vrot.lane.b32.xlu0 %v6159_v39, %s5634_s7 }
0x190e   :  { %3650 = vrot.lane.b32.xlu1 %v6159_v39, %s5635_s10 }
0x1912   :  { %3728 = vrot.lane.b32.xlu1 %v6165_v44, %s5635_s10 }
0x1916   :  { %3726 = vrot.lane.b32.xlu1 %v6165_v44, %s5636_s11 }
0x1982   :  { %v3474_v5 = vpop.xlane.xlu0 %3473 }
0x1983   :  { %v3478_v6 = vsub.f32 %v3470_v58, %v3474_v5 }
0x1985   :  { %v3480_v7 = vmul.f32 1.442695, %v3478_v6 }
0x1986   :  { %v3495_v8 = vpop.permute.xlu0 %3494  ;;  %v3477_v9 = vpop.xlane.xlu1 %3476 }
0x1987   :  { %5544 = vpow2.f32 %v3480_v7  ;;  %v3479_v63 = vsub.f32 %v3471_v1, %v3477_v9  ;;  %5229 = vmatpush3.msk.msra.mxu1 %vm702_vm6, %v3495_v8  ;;  %v4092_v1 = vld [vmem:[%s6437_s14] sm:$0xff]  ;;  %v4094_v7 = vld [vmem:[%s6437_s14 + $0x10] sm:$0xff]  ;;  %v4095_v8 = vld [vmem:[%s6437_s14 + $0x18] sm:$0xff] }
0x1988   :  { %5238 = vmatprep.subr.mxu1 %v5624_v20  ;;  %v5394_v5 = vpack.c.bf16 %v4093_v2, %v4092_v1 }
0x1989   :  { %v3482_v10 = vmul.f32 1.442695, %v3479_v63  ;;  %v5398_v63 = vpack.c.bf16 %v4095_v8, %v4094_v7 }
0x198a   :  { %v3572_v11 = vpop.permute.xlu1 %3571 }
0x198b   :  { %5546 = vpow2.f32 %v3482_v10  ;;  %5234 = vmatpush3.msk.msra.mxu0 %vm702_vm6, %v3572_v11 }
0x198c   :  { %5243 = vmatprep.subr.mxu0 %v5624_v20 }
0x198e   :  { %v3651_v59 = vpop.permute.xlu1 %3650 }
0x1991   :  { %v5545_v12 = vpop.eup %5544 }
0x1992   :  { %v3484_v13 = vsel %vm673_vm5, %v5545_v12, 0.0  ;;  %v3729_v28 = vpop.permute.xlu1 %3728 }
0x1993   :  { %3485 = vadd.xlane.f32.xlu0 %v3484_v13 }
0x1995   :  { %v5547_v15 = vpop.eup %5546 }
0x1996   :  { %v3487_v17 = vsel %vm673_vm5, %v5547_v15, 0.0  ;;  %v3727_v29 = vpop.permute.xlu1 %3726 }
0x1997   :  { %3488 = vadd.xlane.f32.xlu0 %v3487_v17 }
0x19ad   :  { %3648 = vrot.lane.b32.xlu0 %v6159_v39, %s5636_s11 }
0x1a20   :  { %v3486_v18 = vpop.xlane.xlu0 %3485 }
0x1a21   :  { %5548 = vrcp.f32 %v3486_v18 }
0x1a24   :  { %v3489_v19 = vpop.xlane.xlu0 %3488 }
0x1a25   :  { %5550 = vrcp.f32 %v3489_v19 }
0x1a28   :  { %v3649_v43 = vpop.permute.xlu0 %3648 }
0x1a2b   :  { %v5549_v23 = vpop.eup %5548 }
0x1a2c   :  { %v3492_v24 = vmul.f32 %v5549_v23, %v5545_v12 }
0x1a2e   :  { %5231 = vmatmul.mubr.msk.f32.vlgmr.msra.gmra.mrb[40].mxu1 %vm698_vm7, %v3492_v24 }
0x1a2f   :  { %v5551_v27 = vpop.eup %5550  ;;  %5239 = vmatpush3.xpose.msk.msra.mxu1 %vm481_vm4, %v3651_v59  ;;  %5240 = vmatprep.mubr.msk.f32.mxu1 %vm5626_vm3, %v5624_v20 }
0x1a30   :  { %v3493_v48 = vmul.f32 %v5551_v27, %v5547_v15  ;;  %5248 = vmatprep.subr.mxu1 %v5624_v20 }
0x1a32   :  { %5236 = vmatmul.mubr.msk.f32.vlgmr.msra.gmra.mrb[26].mxu0 %vm698_vm7, %v3493_v48  ;;  %5241 = vmatmul.mubr.msk.f32.vlgmr.msra.gmra.mrb[42].mxu1 %vm481_vm4, %v3649_v43 }
0x1a33   :  { %5244 = vmatpush3.xpose.msk.msra.mxu0 %vm481_vm4, %v3729_v28  ;;  %5245 = vmatprep.mubr.msk.f32.mxu0 %vm5626_vm3, %v5624_v20 }
0x1a34   :  { %5253 = vmatprep.subr.mxu0 %v5624_v20  ;;  %5250 = vmatprep.mubr.msk.f32.mxu1 %vm5626_vm3, %v5624_v20 }
0x1a36   :  { %5246 = vmatmul.mubr.msk.f32.vlgmr.msra.gmra.mrb[28].mxu0 %vm481_vm4, %v3727_v29 }
0x1a37   :  { %5255 = vmatprep.mubr.msk.f32.mxu0 %vm5626_vm3, %v5624_v20 }
0x1b01   :  { %v3567_v30 = vpop.f32.mrb[40].mxu1 }
0x1b02   :  { %v5232_v33 = vpop.f32.mrb[41].mxu1 }
0x1b05   :  { %v3644_v34 = vpop.f32.mrb[26].mxu0  ;;  %v3722_v35 = vpop.f32.mrb[42].mxu1 }
0x1b06   :  { %v3804_v21 = vmul.f32 0.35355338, %v3722_v35  ;;  %v5237_v37 = vpop.f32.mrb[27].mxu0  ;;  %v5242_v22 = vpop.f32.mrb[43].mxu1 }
0x1b08   :  { %v3806_v40 = vsel %vm673_vm5, %v3804_v21, -inf }
0x1b09   :  { %3807 = vmax.xlane.f32.xlu0 %v3806_v40  ;;  %v3800_v41 = vpop.f32.mrb[28].mxu0 }
0x1b0a   :  { %v3805_v42 = vmul.f32 0.35355338, %v3800_v41  ;;  %v5247_v45 = vpop.f32.mrb[29].mxu0 }
0x1b0c   :  { %v3809_v46 = vsel %vm673_vm5, %v3805_v42, -inf }
0x1b0d   :  { %3810 = vmax.xlane.f32.xlu1 %v3809_v46 }
0x1b1e   :  { %3905 = vrot.lane.b32.xlu1 %v6165_v44, %s5637_s15 }
0x1b22   :  { %3984 = vrot.lane.b32.xlu1 %v6257_v55, %s5638_s16 }
0x1b26   :  { %3986 = vrot.lane.b32.xlu1 %v6259_v57, %s5638_s16 }
0x1b2a   :  { %3994 = vrot.lane.b32.xlu1 %v3644_v34, %s5639_s18 }
0x1b96   :  { %v3808_v47 = vpop.xlane.xlu0 %3807 }
0x1b97   :  { %v3812_v49 = vsub.f32 %v3804_v21, %v3808_v47 }
0x1b99   :  { %v3814_v50 = vmul.f32 1.442695, %v3812_v49 }
0x1b9a   :  { %v3811_v36 = vpop.xlane.xlu1 %3810 }
0x1b9b   :  { %5552 = vpow2.f32 %v3814_v50  ;;  %v3813_v51 = vsub.f32 %v3805_v42, %v3811_v36 }
0x1b9d   :  { %v3816_v52 = vmul.f32 1.442695, %v3813_v51 }
0x1b9e   :  { %v3906_v53 = vpop.permute.xlu1 %3905 }
0x1b9f   :  { %5554 = vpow2.f32 %v3816_v52  ;;  %5254 = vmatpush3.msk.msra.mxu0 %vm702_vm6, %v3906_v53 }
0x1ba2   :  { %v3985_v10 = vpop.permute.xlu1 %3984 }
0x1ba3   :  { %v4006_v13 = vsel %vm481_vm4, %v6217_v14, %v3985_v10 }
0x1ba5   :  { %v5553_v44 = vpop.eup %5552 }
0x1ba6   :  { %v3818_v54 = vsel %vm673_vm5, %v5553_v44, 0.0  ;;  %v3987_v11 = vpop.permute.xlu1 %3986 }
0x1ba7   :  { %3819 = vadd.xlane.f32.xlu0 %v3818_v54  ;;  %v4007_v24 = vsel %vm481_vm4, %v6219_v16, %v3987_v11 }
0x1ba9   :  { %v5555_v55 = vpop.eup %5554 }
0x1baa   :  { %v3821_v56 = vsel %vm673_vm5, %v5555_v55, 0.0  ;;  %v3995_v15 = vpop.permute.xlu1 %3994 }
0x1bab   :  { %3822 = vadd.xlane.f32.xlu0 %v3821_v56  ;;  %v4009_v27 = vsel %vm1880_vm9, %v4007_v24, %v3995_v15  ;;  %v4295_v15 = vld [vmem:[%s6439_s24 + $0x8] sm:$0xff] }
0x1bc1   :  { %3828 = vrot.lane.b32.xlu0 %v6159_v39, %s5637_s15 }
0x1bc5   :  { %3992 = vrot.lane.b32.xlu0 %v3567_v30, %s5639_s18 }
0x1c34   :  { %v3820_v57 = vpop.xlane.xlu0 %3819 }
0x1c35   :  { %5556 = vrcp.f32 %v3820_v57 }
0x1c38   :  { %v3823_v38 = vpop.xlane.xlu0 %3822 }
0x1c39   :  { %5558 = vrcp.f32 %v3823_v38 }
0x1c3c   :  { %v3829_v58 = vpop.permute.xlu0 %3828 }
0x1c3d   :  { %5249 = vmatpush3.msk.msra.mxu1 %vm702_vm6, %v3829_v58 }
0x1c3e   :  { %5395 = vmatprep.subr.bf16.mxu1 %v5394_v5 }
0x1c3f   :  { %v5557_v60 = vpop.eup %5556 }
0x1c40   :  { %v3826_v61 = vmul.f32 %v5557_v60, %v5553_v44  ;;  %v3993_v12 = vpop.permute.xlu0 %3992 }
0x1c41   :  { %v4008_v17 = vsel %vm1880_vm9, %v4006_v13, %v3993_v12  ;;  %v4294_v13 = vld [vmem:[%s6439_s24] sm:$0xff] }
0x1c42   :  { %5251 = vmatmul.mubr.msk.f32.vlgmr.msra.gmra.mrb[44].mxu1 %vm698_vm7, %v3826_v61  ;;  %v4897_v61 = vld [vmem:[%s6438_s19] ss:$0 sm:$0xff] }
0x1c43   :  { %v5559_v62 = vpop.eup %5558  ;;  %5397 = vmatpush3.bf16.msra.mxu1 %v5394_v5 }
0x1c44   :  { %v3827_v0 = vmul.f32 %v5559_v62, %v5555_v55  ;;  %5399 = vmatprep.subr.bf16.mxu1 %v5398_v63 }
0x1c46   :  { %5256 = vmatmul.mubr.msk.f32.vlgmr.msra.gmra.mrb[30].mxu0 %vm698_vm7, %v3827_v0 }
0x1c47   :  { %5401 = vmatpush3.bf16.msra.mxu1 %v5398_v63 }
0x1d15   :  { %v3901_v39 = vpop.f32.mrb[44].mxu1 }
0x1d16   :  { %4000 = vrot.lane.b32.xlu0 %v3901_v39, %s5640_s22  ;;  %v5252_v4 = vpop.f32.mrb[45].mxu1 }
0x1d19   :  { %v3978_v6 = vpop.f32.mrb[30].mxu0 }
0x1d1a   :  { %4002 = vrot.lane.b32.xlu1 %v3978_v6, %s5640_s22  ;;  %v5257_v9 = vpop.f32.mrb[31].mxu0 }
0x1d88   :  { %v4001_v18 = vpop.permute.xlu0 %4000 }
0x1d89   :  { %v4010_v19 = vsel %vm1883_vm8, %v4008_v17, %v4001_v18  ;;  %v5402_v17 = vpack.c.bf16 %v4295_v15, %v4294_v13  ;;  %v4296_v18 = vld [vmem:[%s6439_s24 + $0x10] sm:$0xff] }
0x1d8a   :  { %v4014_v59 = vcombine.high %v4010_v19, %v4010_v19  ;;  %v4021_v23 = vrot.slane %v4010_v19, %v5866_v26  ;;  %v4297_v19 = vld [vmem:[%s6439_s24 + $0x18] sm:$0xff] }
0x1d8b   :  { %5403 = vmatprep.subr.bf16.mxu0 %v5402_v17 }
0x1d8c   :  { %v4029_v28 = vcombine.high %v4021_v23, %v4021_v23  ;;  %v4003_v48 = vpop.permute.xlu1 %4002  ;;  %v4028_v43 = vrot.slane %v4014_v59, %v5866_v26  ;;  %v4036_v29 = vrot.slane %v4021_v23, %v5866_v26  ;;  %5405 = vmatpush3.bf16.msra.mxu0 %v5402_v17  ;;  %v5406_v59 = vpack.c.bf16 %v4297_v19, %v4296_v18 }
0x1d8d   :  { %v4011_v14 = vsel %vm1883_vm8, %v4009_v27, %v4003_v48  ;;  %v4555_v19 = vsub.s32 1, %v5863_v25 }
0x1d8e   :  { %v4050_v30 = vrot.slane %v4029_v28, %v5866_v26  ;;  %v4053_v33 = vcombine.high %v4011_v14, %v4011_v14  ;;  %v4060_v34 = vrot.slane %v4011_v14, %v5866_v26  ;;  %v4043_v22 = vrot.slane %v4028_v43, %v5866_v26  ;;  %5407 = vmatprep.subr.bf16.mxu0 %v5406_v59 }
0x1d90   :  { %v4096_v35 = vcombine.low %v4036_v29, %v4050_v30  ;;  %v4894_v21 = vcombine.high %v4036_v29, %v4050_v30  ;;  %v4067_v37 = vrot.slane %v4053_v33, %v5866_v26  ;;  %v4068_v16 = vcombine.high %v4060_v34, %v4060_v34  ;;  %5409 = vmatpush3.bf16.msra.mxu0 %v5406_v59  ;;  %v4898_v29 = vld [vmem:[%s6440_s30] ss:$0 sm:$0xff] }
0x1d91   :  { %v4075_v40 = vrot.slane %v4060_v34, %v5866_v26  ;;  %5426 = vmatprep.subr.bf16.mxu0 %v5623_v3  ;;  %v4899_v33 = vld [vmem:[%s6441_s6] ss:$0 sm:$0xff] }
0x1d92   :  { %v4089_v41 = vrot.slane %v4068_v16, %v5866_v26  ;;  %v4106_v42 = vrot.slane %v4096_v35, %v5866_v26  ;;  %v4113_v45 = vrot.slane %v4894_v21, %v5866_v26  ;;  %v4082_v49 = vrot.slane %v4067_v37, %v5866_v26 }
0x1d93   :  { %v4090_v46 = vcombine.high %v4075_v40, %v4075_v40  ;;  %v4098_v47 = vcombine.low %v4043_v22, %v4075_v40  ;;  %v4396_v40 = vld [vmem:[%s6442_s23] sm:$0xff] }
0x1d94   :  { %v4091_v50 = vcombine.high %v4089_v41, %v4089_v41  ;;  %v4128_v52 = vcombine.low %v4106_v42, %v4113_v45  ;;  %v4398_v45 = vld [vmem:[%s6442_s23 + $0x10] sm:$0xff] }
0x1d95   :  { %v4099_v36 = vcombine.low %v4089_v41, %v4090_v46  ;;  %v4120_v53 = vrot.slane %v4098_v47, %v5866_v26  ;;  %v4397_v41 = vld [vmem:[%s6442_s23 + $0x8] sm:$0xff]  ;;  %v4399_v46 = vld [vmem:[%s6442_s23 + $0x18] sm:$0xff] }
0x1d96   :  { %v4145_v51 = vcombine.low %v4091_v50, %v4082_v49  ;;  %v4136_v56 = vrot.slane %v4128_v52, %v5866_v26  ;;  %v5410_v42 = vpack.c.bf16 %v4397_v41, %v4396_v40  ;;  %v5414_v47 = vpack.c.bf16 %v4399_v46, %v4398_v45  ;;  %v4400_v49 = vld [vmem:[%s6442_s23 + $0x20] sm:$0xff]  ;;  %v4401_v50 = vld [vmem:[%s6442_s23 + $0x28] sm:$0xff] }
0x1d97   :  { %v4127_v44 = vrot.slane %v4099_v36, %v5866_v26  ;;  %v5418_v36 = vpack.c.bf16 %v4401_v50, %v4400_v49  ;;  %v4906_v45 = vld [vmem:[%s6445_s1] ss:$0 sm:$0xff] }
0x1d98   :  { %v4152_v55 = vrot.slane %v4145_v51, %v5866_v26  ;;  %5411 = vmatprep.subr.bf16.mxu1 %v5410_v42  ;;  %v4402_v51 = vld [vmem:[%s6442_s23 + $0x30] sm:$0xff]  ;;  %v4907_v46 = vld [vmem:[%s5780_s12] ss:$0 sm:$0xff]  ;;  %s5641_s12 = smov [#allocation2]  }
0x1d99   :  { %v4129_v54 = vcombine.low %v4120_v53, %v4127_v44  ;;  %v4900_v53 = vld [vmem:[%s6443_s26] ss:$0 sm:$0xff]  ;;  %v4642_v49 = vrot.slane %v4907_v46, %v5866_v26 }
0x1d9a   :  { %v4159_v58 = vrot.slane %v4152_v55, %v5866_v26 }
0x1d9b   :  { %v4143_v57 = vrot.slane %v4129_v54, %v5866_v26 }
0x1d9d   :  { %v4144_v38 = vcombine.low %v4136_v56, %v4143_v57 }
0x1d9f   :  { %5266 = vmatprep.mubr.msk.f32.mxu1 %vm237_vm1, %v4144_v38 }
0x1da0   :  { %5267 = vmatmul.mubr.msk.f32.vlgmr.msra.gmra.mrb[46].mxu1 %vm237_vm1, %v4159_v58 }
0x1da1   :  { %5413 = vmatpush3.bf16.msra.mxu1 %v5410_v42 }
0x1da2   :  { %5415 = vmatprep.subr.bf16.mxu1 %v5414_v47 }
0x1da5   :  { %5417 = vmatpush3.bf16.msra.mxu1 %v5414_v47  ;;  %v4611_v47 = vrot.slane %v4906_v45, %v5866_v26 }
0x1da6   :  { %5419 = vmatprep.subr.bf16.mxu1 %v5418_v36 }
0x1da7   :  { %v4612_v50 = vcombine.high %v4611_v47, %v4611_v47 }
0x1da9   :  { %5421 = vmatpush3.bf16.msra.mxu1 %v5418_v36  ;;  %v4643_v36 = vcombine.high %v4642_v49, %v4642_v49 }
0x1e73   :  { %v5268_v60 = vpop.f32.mrb[46].mxu1 }
0x1e74   :  { %v4240_v62 = vadd.f32 %v5268_v60, %v6119_v31  ;;  %v4230_v0 = vpop.f32.mrb[47].mxu1 }
0x1e75   :  { %v4239_v39 = vadd.f32 %v4230_v0, %v6121_v32 }
0x1e76   :  { %v4249_v1 = vadd.f32 %v4897_v61, %v4240_v62 }
0x1e77   :  { %v6352_v2 = vadd.f32 %v4897_v61, %v4239_v39 }
0x1e78   :  { %v4255_v4 = vsel %vm241_vm2, %v4249_v1, 0.0 }
0x1e79   :  { %4256 = vadd.xlane.f32.xlu1 %v4255_v4  ;;  %v4252_v5 = vsel %vm237_vm1, %v6352_v2, 0.0 }
0x1e7a   :  { %4253 = vadd.xlane.f32.xlu0 %v4252_v5 }
0x1f06   :  { %v4257_v6 = vpop.xlane.xlu1 %4256 }
0x1f07   :  { %v4259_v7 = vmul.f32 0.03125, %v4257_v6  ;;  %v4254_v8 = vpop.xlane.xlu0 %4253 }
0x1f08   :  { %v4258_v31 = vmul.f32 0.03125, %v4254_v8 }
0x1f09   :  { %v4261_v9 = vsub.f32 %v4249_v1, %v4259_v7  ;;  %v4905_v7 = vld [vmem:[%s6444_s28] ss:$0 sm:$0xff] }
0x1f0a   :  { %v4260_v32 = vsub.f32 %v6352_v2, %v4258_v31 }
0x1f0b   :  { %v4263_v11 = vmul.f32 %v4261_v9, %v4261_v9 }
0x1f0c   :  { %v4262_v63 = vmul.f32 %v4260_v32, %v4260_v32 }
0x1f0d   :  { %v4267_v12 = vsel %vm241_vm2, %v4263_v11, 0.0 }
0x1f0e   :  { %v4264_v10 = vsel %vm237_vm1, %v4262_v63, 0.0 }
0x1f0f   :  { %4265 = vadd.xlane.f32.xlu0 %v4264_v10 }
0x1f13   :  { %4268 = vadd.xlane.f32.xlu0 %v4267_v12 }
0x1f9c   :  { %v4266_v23 = vpop.xlane.xlu0 %4265 }
0x1f9d   :  { %v4270_v24 = vmul.f32 0.03125, %v4266_v23 }
0x1f9f   :  { %v4272_v27 = vadd.f32 1e-05, %v4270_v24 }
0x1fa0   :  { %v4269_v28 = vpop.xlane.xlu0 %4268 }
0x1fa1   :  { %5560 = vrsqrt.f32 %v4272_v27  ;;  %v4271_v48 = vmul.f32 0.03125, %v4269_v28 }
0x1fa3   :  { %v4273_v43 = vadd.f32 1e-05, %v4271_v48 }
0x1fa5   :  { %5562 = vrsqrt.f32 %v4273_v43 }
0x1fab   :  { %v5561_v14 = vpop.eup %5560 }
0x1fac   :  { %v4276_v30 = vmul.f32 %v5561_v14, %v4260_v32 }
0x1fae   :  { %v4284_v34 = vmul.f32 %v4898_v29, %v4276_v30 }
0x1faf   :  { %v5563_v35 = vpop.eup %5562 }
0x1fb0   :  { %v4277_v21 = vmul.f32 %v5563_v35, %v4261_v9  ;;  %v4292_v37 = vadd.f32 %v4899_v33, %v4284_v34  ;;  %v4663_v35 = vld [vmem:[%s5785_s20 + $0x8] sm:$0xff] }
0x1fb2   :  { %v4285_v16 = vmul.f32 %v4898_v29, %v4277_v21  ;;  %5277 = vmatprep.mubr.msk.f32.mxu0 %vm237_vm1, %v4292_v37  ;;  %v4664_v37 = vld [vmem:[%s5785_s20 + $0x10] sm:$0xff] }
0x1fb4   :  { %v4293_v22 = vadd.f32 %v4899_v33, %v4285_v16  ;;  %v4665_v16 = vld [vmem:[%s5785_s20 + $0x18] sm:$0xff] }
0x1fb6   :  { %5278 = vmatmul.mubr.msk.f32.vlgmr.msra.gmra.mrb[32].mxu0 %vm237_vm1, %v4293_v22  ;;  %v5430_v22 = vpack.c.bf16 %v4665_v16, %v4664_v37 }
0x1fb7   :  { %5307 = vmatprep.mubr.msk.f32.mxu0 %vm5626_vm3, %v5624_v20  ;;  %v4403_v20 = vld [vmem:[%s6442_s23 + $0x38] sm:$0xff] }
0x1fb8   :  { %v5422_v52 = vpack.c.bf16 %v4403_v20, %v4402_v51  ;;  %v4619_v20 = vrot.slane %v4611_v47, %v5866_v26 }
0x1fba   :  { %5423 = vmatprep.subr.bf16.mxu1 %v5422_v52 }
0x1fbb   :  { %5425 = vmatpush3.bf16.msra.mxu1 %v5422_v52  ;;  %v4626_v52 = vrot.slane %v4612_v50, %v5866_v26 }
0x2089   :  { %v5279_v44 = vpop.f32.mrb[32].mxu0 }
0x208a   :  { %v4383_v54 = vadd.f32 %v5279_v44, %v4900_v53  ;;  %v4377_v55 = vpop.f32.mrb[33].mxu0  ;;  %v4650_v44 = vrot.slane %v4642_v49, %v5866_v26 }
0x208b   :  { %v4378_v56 = vadd.f32 %v4900_v53, %v4377_v55 }
0x208c   :  { %v4389_v57 = vmul.f32 0.70710677, %v4383_v54  ;;  %v4387_v39 = vmul.f32 0.5, %v4383_v54  ;;  %v4657_v54 = vrot.slane %v4643_v36, %v5866_v26 }
0x208d   :  { %v4388_v38 = vmul.f32 0.70710677, %v4378_v56  ;;  %v4386_v62 = vmul.f32 0.5, %v4378_v56 }
0x208e   :  { %5564 = verf.f32 %v4389_v57 }
0x208f   :  { %5566 = verf.f32 %v4388_v38 }
0x2098   :  { %v5565_v58 = vpop.eup %5564 }
0x2099   :  { %v5567_v60 = vpop.eup %5566  ;;  %v4393_v61 = vadd.f32 1.0, %v5565_v58 }
0x209a   :  { %v4392_v0 = vadd.f32 1.0, %v5567_v60 }
0x209b   :  { %v4395_v4 = vmul.f32 %v4393_v61, %v4387_v39  ;;  %v4908_v39 = vld [vmem:[%s5790_s27] ss:$0 sm:$0xff] }
0x209c   :  { %v4394_v1 = vmul.f32 %v4392_v0, %v4386_v62 }
0x209e   :  { %5296 = vmatprep.mubr.msk.f32.mxu1 %vm153_vm0, %v4394_v1 }
0x209f   :  { %5297 = vmatmul.mubr.msk.f32.vlgmr.msra.gmra.mrb[48].mxu1 %vm153_vm0, %v4395_v4 }
0x2172   :  { %v5298_v5 = vpop.f32.mrb[48].mxu1 }
0x2173   :  { %v4476_v6 = vpop.f32.mrb[49].mxu1 }
0x2174   :  { %v4484_v8 = vadd.f32 %v4476_v6, %v6352_v2  ;;  %v4551_v2 = vsub.s32 0, %v5863_v25  ;;  %v4662_v25 = vld [vmem:[%s5785_s20] sm:$0xff]  ;;  %s4769_s20 = sshll.u32 %s5641_s12, 4  ;;  %s4770_s20 = int_to_ptr.vmem [resolvable:$true] %s4769_s20 }
0x2175   :  { %v5427_v21 = vpack.c.bf16 %v4663_v35, %v4662_v25  ;;  %s5570_s2 = scalar_lea.vmem %s4770_s20, 32  ;;  %p5575_p1 = scmp.lt.s32.totalorder %s4770_s20, %s4770_s20 }
0x2176   :  { %v4492_v31 = vadd.f32 %v4905_v7, %v4484_v8  ;;  %p5571_p0 = scmp.ne.s32.totalorder %s4770_s20, %s5570_s2  ;;  %p5576_p2 = scmp.lt.s32.totalorder %s5570_s2, %s5570_s2 }
0x2177   :  { %5428 = vmatpush3.bf16.msra.mxu0 %v5427_v21 }
0x2178   :  { %v4494_v9 = vcombine.high %v4492_v31, %v4492_v31  ;;  %v4501_v32 = vrot.slane %v4492_v31, %v5866_v26  ;;  %5429 = vmatprep.subr.bf16.mxu0 %v5623_v3  ;;  %p5577_p3 = por %p5576_p2, %p5575_p1 }
0x217a   :  { %v4508_v63 = vrot.slane %v4494_v9, %v5866_v26  ;;  %v4516_v11 = vrot.slane %v4501_v32, %v5866_v26  ;;  %p5578_p4 = pnand %p5577_p3, %p5571_p0 }
0x217b   :  { %5431 = vmatpush3.bf16.msra.mxu0 %v5430_v22 }
0x217c   :  { %v4509_v10 = vcombine.high %v4508_v63, %v4508_v63 }
0x217e   :  { %v4523_v12 = vrot.slane %v4509_v10, %v5866_v26 }
0x2180   :  { %v4528_v13 = vcombine.low %v4516_v11, %v4523_v12 }
0x2182   :  { %v4535_v15 = vrot.slane %v4528_v13, %v5866_v26 }
0x2184   :  { %v4542_v17 = vrot.slane %v4535_v15, %v5866_v26 }
0x2186   :  { %v4544_v18 = vsel %vm241_vm2, %v4542_v17, 0.0 }
0x2187   :  { %4545 = vadd.xlane.f32.xlu0 %v4544_v18 }
0x2214   :  { %v4546_v59 = vpop.xlane.xlu0 %4545 }
0x2215   :  { %v4547_v23 = vmul.f32 0.03125, %v4546_v59 }
0x2217   :  { %v4552_v24 = vrot.slane %v4547_v23, %v4551_v2  ;;  %v4556_v27 = vrot.slane %v4547_v23, %v4555_v19 }
0x2219   :  { %v4559_v28 = vsub.f32 %v4516_v11, %v4552_v24  ;;  %v4560_v48 = vsub.f32 %v4523_v12, %v4556_v27 }
0x221b   :  { %v4561_v43 = vmul.f32 %v4559_v28, %v4559_v28  ;;  %v4562_v14 = vmul.f32 %v4560_v48, %v4560_v48 }
0x221d   :  { %v4565_v29 = vcombine.low %v4561_v43, %v4562_v14 }
0x221f   :  { %v4572_v30 = vrot.slane %v4565_v29, %v5866_v26 }
0x2221   :  { %v4579_v33 = vrot.slane %v4572_v30, %v5866_v26 }
0x2223   :  { %v4581_v34 = vsel %vm241_vm2, %v4579_v33, 0.0 }
0x2224   :  { %4582 = vadd.xlane.f32.xlu1 %v4581_v34 }
0x22b1   :  { %v4583_v40 = vpop.xlane.xlu1 %4582 }
0x22b2   :  { %v4584_v41 = vmul.f32 0.03125, %v4583_v40 }
0x22b4   :  { %v4585_v42 = vadd.f32 1e-05, %v4584_v41 }
0x22b6   :  { %5568 = vrsqrt.f32 %v4585_v42 }
0x22c0   :  { %v5569_v51 = vpop.eup %5568 }
0x22c1   :  { %v4591_v3 = vrot.slane %v5569_v51, %v4551_v2  ;;  %v4595_v53 = vrot.slane %v5569_v51, %v4555_v19 }
0x22c3   :  { %v4598_v55 = vmul.f32 %v4591_v3, %v4559_v28  ;;  %v4599_v56 = vmul.f32 %v4595_v53, %v4560_v48 }
0x22c5   :  { %v4629_v57 = vmul.f32 %v4619_v20, %v4598_v55  ;;  %v4630_v38 = vmul.f32 %v4626_v52, %v4599_v56 }
0x22c7   :  { %v4660_v58 = vadd.f32 %v4650_v44, %v4629_v57  ;;  %v4661_v60 = vadd.f32 %v4657_v54, %v4630_v38 }
0x22c9   :  { %v4675_v61 = vcombine.low %v4660_v58, %v4661_v60 }
0x22cb   :  { %v4682_v62 = vrot.slane %v4675_v61, %v5866_v26 }
0x22cd   :  { %v4689_v0 = vrot.slane %v4682_v62, %v5866_v26 }
0x22cf   :  { %5308 = vmatmul.mubr.msk.f32.vlgmr.msra.gmra.mrb[34].mxu0 %vm237_vm1, %v4689_v0 }
0x23a2   :  { %v4758_v1 = vpop.f32.mrb[34].mxu0 }
0x23a3   :  { %v4759_v4 = vadd.f32 %v4908_v39, %v4758_v1  ;;  %v5309_v5 = vpop.f32.mrb[35].mxu0 }
0x23a5   :  { %4762 = vst [vmem:[#allocation2] sm:$0x3] %v4759_v4 }
0x23a6   :  { %5581 = shalt.err (!%p5578_p4)
}
0x23a7   :  { %s5582_s0 = scalar_lea.hbm %s5795_s4, 32 }
0x23a8   :  { %p5583_p5 = scmp.ne.s32.totalorder %s5795_s4, %s5582_s0  ;;  %p5586_p6 = scmp.lt.u32.totalorder %s5582_s0, %s5795_s4 }
0x23aa   :  { %p5588_p7 = pnand %p5586_p6, %p5583_p5 }
0x23ac   :  { %5591 = shalt.err (!%p5588_p7)
}
0x23ad   :  { %4772 = dma.vmem_to_hbm [thread:$0]  %s4770_s20, 32, %s5795_s4, [#allocation3]  }
0x23ae   :  { %5592 = dma.done.wait [#allocation3], 32  }
0x23af   :  { %5593 = vsyncadd [#allocation3], 4294967264 }
0x23b0   :  { %4776 = vsyncpa [#allocation3], 1 }

</bundles_post_ra>
